<compile_context>
chip_gen: v7x
topology: tpu7x:2x2x1
jax: 0.10.0
libtpu: 0.0.40
codegen_flags: <defaults>
</compile_context>

<pallas_src>
import functools
import math

import jax
import jax.numpy as jnp
from jax.experimental import pallas as pl
from jax.experimental.pallas import tpu as pltpu


def _shuffle_kernel(x_ref, sel_ref, o_ref, *, precision):
    # x_ref: (tile_rows, G*in_w), sel_ref: (G*in_w, G*out_w) block-diag one-hot,
    # o_ref: (tile_rows, G*out_w).  Column gather == MXU matmul with one-hot weights.
    o_ref[...] = jnp.dot(
        x_ref[...], sel_ref[...],
        preferred_element_type=jnp.float32,
        precision=precision,
    ).astype(o_ref.dtype)


def shuffle_forward(x, indices, *, tile_bytes=8 << 20, max_fold=None,
                    vmem_limit_bytes=48 << 20):
    """Pallas forward matching Shuffle.forward: returns x[:, indices]."""
    n, in_w = x.shape
    out_w = int(indices.shape[0])
    dtype = x.dtype
    if not jnp.issubdtype(dtype, jnp.floating):
        # TODO(synk): integer/bool inputs need a non-MXU gather path (v7x MXU is fp-only).
        raise NotImplementedError("shuffle_forward supports floating-point inputs only")
    itemsize = dtype.itemsize

    # Exactness: bf16 x {0,1} is exact at default precision; wider float inputs need
    # the multi-pass f32 MXU path so operands aren't truncated to bf16.
    precision = None if dtype == jnp.bfloat16 else jax.lax.Precision.HIGHEST

    # ---- lane-density fold: pack G consecutive rows into the lane dimension -------
    if max_fold is None:
        max_fold = 8 if itemsize >= 4 else 16   # f32 HIGHEST = multi-pass MXU (v5e!)
    g_in = 128 // math.gcd(in_w, 128)
    g_out = 128 // math.gcd(out_w, 128)
    G = (g_in * g_out) // math.gcd(g_in, g_out)  # lcm; power of two in [1, 128]
    G = min(G, max_fold)
    while G > 1 and n % G != 0:                  # keep the fold exact without padding
        G //= 2
    while G > 1 and (G * in_w) * (G * out_w) * itemsize > (2 << 20):
        G //= 2                                  # keep sel a small VMEM-resident constant
    G = max(G, 1)

    # One-hot selection matrix in x's dtype (0.0 / 1.0 are exact in every float dtype).
    sel = (jnp.arange(in_w, dtype=jnp.int32)[:, None]
           == indices[None, :].astype(jnp.int32)).astype(dtype)        # (in_w, out_w)
    if G > 1:
        sel = jnp.kron(jnp.eye(G, dtype=dtype), sel)                    # (G*in_w, G*out_w)
        xf = x.reshape(n // G, G * in_w)                                # contiguous -> free
    else:
        xf = x
    fn = xf.shape[0]
    fin, fout = G * in_w, G * out_w

    # ---- row tiling: big tiles amortize the ~0.35 us per-grid-step overhead --------
    row_bytes = (fin + fout) * itemsize
    tile_rows = max(8, int(tile_bytes) // row_bytes)
    tile_rows -= tile_rows % 8
    if fn >= 16:
        # keep >= 2 grid steps so the "parallel" axis can use both TCs on v7x
        half = (((fn + 1) // 2) + 7) // 8 * 8
        tile_rows = min(tile_rows, half)
    if tile_rows >= fn:
        tile_rows = fn                                                  # single full block
    grid = (pl.cdiv(fn, tile_rows),)

    kernel = functools.partial(_shuffle_kernel, precision=precision)
    out = pl.pallas_call(
        kernel,
        out_shape=jax.ShapeDtypeStruct((fn, fout), dtype),
        grid=grid,
        in_specs=[
            pl.BlockSpec((tile_rows, fin), lambda i: (i, 0)),   # streamed over rows
            pl.BlockSpec((fin, fout), lambda i: (0, 0)),        # resident selection matrix
        ],
        out_specs=pl.BlockSpec((tile_rows, fout), lambda i: (i, 0)),
        compiler_params=pltpu.CompilerParams(
            dimension_semantics=("parallel",),
            vmem_limit_bytes=vmem_limit_bytes),
        cost_estimate=pl.CostEstimate(
            flops=2 * fn * fin * fout,
            transcendentals=0,
            bytes_accessed=(fn * fin + fn * fout + fin * fout) * itemsize),
    )(xf, sel)

    return out.reshape(n, out_w)


if __name__ == "__main__":
    key = jax.random.PRNGKey(0)
    input_width, output_width = 24, 40     # output_width > input_width exercises the repeat
    n = 256

    k_perm, k_x = jax.random.split(key)

    # Deterministic index construction mirroring Shuffle.__init__:
    #   rep_indices = arange(input_width).repeat(ceil(out/in)); indices = rep_indices[randperm(out)]
    reps = (output_width + input_width - 1) // input_width
    rep_indices = jnp.tile(jnp.arange(input_width, dtype=jnp.int32), reps)
    perm = jax.random.permutation(k_perm, output_width)
    indices = rep_indices[perm][:output_width]

    # f32 path: lane-dense fold (G=8), multi-tile grid, HIGHEST precision -> bit-exact.
    x = jax.random.normal(k_x, (n, input_width), dtype=jnp.float32)
    out = jax.block_until_ready(shuffle_forward(x, indices))
    ref = x[:, indices]
    assert out.shape == (n, output_width)
    assert jnp.array_equal(out, ref), "f32 mismatch vs reference"

    # Non-power-of-two batch: fold falls back to a smaller G, ragged last tile.
    x2 = jax.random.normal(k_x, (50, input_width), dtype=jnp.float32)
    out2 = jax.block_until_ready(shuffle_forward(x2, indices))
    assert jnp.array_equal(out2, x2[:, indices]), "ragged-batch mismatch vs reference"

    # bf16 path: native single-pass bf16 MXU, exact with one-hot weights.
    xb = x.astype(jnp.bfloat16)
    outb = jax.block_until_ready(shuffle_forward(xb, indices))
    assert outb.dtype == jnp.bfloat16
    assert jnp.array_equal(outb, xb[:, indices]), "bf16 mismatch vs reference"

    print("KERNEL_OK")
</pallas_src>

<mosaic_0001>
module attributes {stable_mosaic.version = 11 : i64} {
  func.func @_shuffle_kernel(%arg0: i32, %arg1: memref<16x192xf32, #tpu.memory_space<vmem>>, %arg2: memref<192x320xf32, #tpu.memory_space<vmem>>, %arg3: memref<16x320xf32, #tpu.memory_space<vmem>>) attributes {dimension_semantics = [#tpu.dimension_semantics<parallel>], iteration_bounds = array<i64: 2>, scalar_prefetch = 0 : i64, scratch_operands = 0 : i64, tpu.core_type = #tpu.core_type<tc>, window_params = [{transform_indices = @transform_0, window_bounds = array<i64: 16, 192>}, {pipeline_mode = #tpu.pipeline_mode<synchronous>, transform_indices = @transform_1, window_bounds = array<i64: 192, 320>}, {transform_indices = @transform_2, window_bounds = array<i64: 16, 320>}]} {
    %c0 = arith.constant 0 : index
    %c0_0 = arith.constant 0 : index
    %0 = vector.load %arg1[%c0, %c0_0] : memref<16x192xf32, #tpu.memory_space<vmem>>, vector<16x192xf32>
    %c0_1 = arith.constant 0 : index
    %c0_2 = arith.constant 0 : index
    %1 = vector.load %arg2[%c0_1, %c0_2] : memref<192x320xf32, #tpu.memory_space<vmem>>, vector<192x320xf32>
    %cst = arith.constant dense<0.000000e+00> : vector<16x320xf32>
    %2 = tpu.matmul %0, %1, %cst {dimension_numbers = #tpu.dot_dimension_numbers<[1], [0], [0], [1], [0, 0, 1, 1], [], []>, precision = #tpu.contract_precision<fp32>} : vector<16x192xf32>, vector<192x320xf32>, vector<16x320xf32> -> vector<16x320xf32>
    %c0_3 = arith.constant 0 : index
    %c0_4 = arith.constant 0 : index
    %3 = vector.load %arg3[%c0_3, %c0_4] : memref<16x320xf32, #tpu.memory_space<vmem>>, vector<16x320xf32>
    tpu.vector_store %arg3[%c0_3, %c0_4], %2 {strides = array<i32>} : memref<16x320xf32, #tpu.memory_space<vmem>>, vector<16x320xf32>,
    return
  }
  func.func @transform_0(%arg0: i32) -> (i32, i32) {
    %c0_i32 = arith.constant 0 : i32
    %c0_i32_0 = arith.constant 0 : i32
    return %arg0, %c0_i32 : i32, i32
  }
  func.func @transform_1(%arg0: i32) -> (i32, i32) {
    %c0_i32 = arith.constant 0 : i32
    %c0_i32_0 = arith.constant 0 : i32
    %c0_i32_1 = arith.constant 0 : i32
    return %c0_i32, %c0_i32_0 : i32, i32
  }
  func.func @transform_2(%arg0: i32) -> (i32, i32) {
    %c0_i32 = arith.constant 0 : i32
    %c0_i32_0 = arith.constant 0 : i32
    return %arg0, %c0_i32 : i32, i32
  }
}

</mosaic_0001>

<bundles_post_ra>
// kernel: tpu_custom_call.1
= control target key start
LH: loop header
LB: loop body
LE: loop exit
PB: predicated region body
PF: predicated region fallthrough
CT: control target
= control target key end

     0   :  { %7 = vsyncpa [#allocation3], 0  ;;  %s4387_s0 = inlined_call_operand.hbm [shape: f32[32,192], index: 0, kind: input, shape index: {}]   ;;  %s4388_s1 = inlined_call_operand.hbm [shape: f32[192,320], index: 1, kind: input, shape index: {}]   ;;  %s4389_s2 = inlined_call_operand.hbm [shape: f32[32,320], index: 2, kind: output, shape index: {}]  }
   0x1   :  { %9 = vsyncpa [#allocation3 + $0x1], 0 }
   0x2   :  { %10 = vsyncpa [#allocation6], 0 }
   0x3   :  { %11 = vsyncpa [#allocation4], 0 }
   0x4   :  { %13 = vsyncpa [#allocation4 + $0x1], 0  ;;  %s3102_s9 = smov 0   ;;  %s3104_s10 = smov 0  }
   0x5   :  { %s3106_s11 = smov 0   ;;  %s3108_s12 = smov 0  }
   0x6 LB: > { %s3123_s13 = sadd.s32 4294967295, %s3075_s12   ;;  %s2319_s14 = sadd.s32 4294967294, %s3075_s12   ;;  %s3075_s12 = sphi %s3108_s12, %s5003_s12   ;;  %s3071_s11 = sphi %s3106_s11, %s5002_s11   ;;  %s3067_s10 = sphi %s3104_s10, %s5001_s10   ;;  %s3063_s9 = sphi %s3102_s9, %s5000_s9  }
   0x7   : > { %p39_p0 = scmp.ne.s32.totalorder %s3067_s10, %s3063_s9  ;;  %p4390_p1 = scmp.eq.s32.totalorder %s3123_s13, 0 }
   0x8   : > { %p90_p3 = scmp.eq.s32.totalorder %s2319_s14, 1  ;;  %p2320_p5 = scmp.ge.s32.totalorder %s3075_s12, 1 }
   0x9   : > { %p3132_p4 = por %p4390_p1, %p39_p0  ;;  %p97_p7 = scmp.lt.s32.totalorder %s3075_s12, 3 }
   0xa   : > { %p3137_p6 = por %p90_p3, %p39_p0  ;;  %s3077_s18 = smov [#allocation5]  }
   0xb   : > { %s4645_s15 = scalar_select %p3132_p4, 1, 0 }
   0xc   : > { %s4646_s16 = scalar_select %p3137_p6, 1, 0 }
   0xd   : > { %p3142_p8 = pnand %p2320_p5, %p97_p7  ;;  %s109_s19 = sshll.u32 %s3077_s18, 4  ;;  %s3146_s19 = int_to_ptr.vmem [resolvable:$true] %s109_s19 }
   0xe   : > { %s3158_s21 = sadd.s32 1, %s3075_s12   ;;  %s26_s22 = sadd.s32 1, %s3071_s11 }
   0xf   : > { %s4647_s17 = scalar_select %p3142_p8, 1, 0 }
  0x10   : > { %p2891_p9 = pneg %p3142_p8  ;;  %s23_s23 = ssub.s32 %s3075_s12, %s3158_s21 }
  0x11   : > { %s2947_s26 = scalar_lea.hbm %s4388_s1, 9216 }
  0x12   : > { %p3153_p11 = pnand %p2891_p9, %p4390_p1  ;;  %p2948_p12 = scmp.ne.s32.totalorder %s4388_s1, %s2947_s26 }
  0x13   : > { %p2954_p5 = scmp.lt.u32.totalorder %s2947_s26, %s4388_s1 }
  0x14   : > { %p2949_p13 = pneg %p3153_p11 }
  0x16   : > { %p2950_p0 = pnand %p2949_p13, %p2948_p12 }
  0x18   : > { %p2951_p3 = pneg %p2950_p0 }
  0x1a   : > { %p2956_p7 = pnand %p2954_p5, %p2951_p3 }
  0x1c   : > { %2959 = shalt.err (!%p2956_p7)
}
  0x1d   : > { %s2960_s3 = scalar_lea.vmem %s3146_s19, 9216  ;;  %p2968_p2 = scmp.lt.s32.totalorder %s3146_s19, %s3146_s19 }
  0x1e   : > { %p2961_p9 = scmp.ne.s32.totalorder %s3146_s19, %s2960_s3  ;;  %p2969_p6 = scmp.lt.s32.totalorder %s2960_s3, %s2960_s3 }
  0x20   : > { %p2963_p10 = pnand %p2961_p9, %p2949_p13  ;;  %p2970_p4 = por %p2969_p6, %p2968_p2 }
  0x22   : > { %p2964_p1 = pneg %p2963_p10 }
  0x24   : > { %p2971_p8 = pnand %p2970_p4, %p2964_p1 }
  0x26   : > { %2974 = shalt.err (!%p2971_p8)
}
  0x27   : > { %s3078_s4 = smov 384   ;;  %s3079_s5 = smov 24  }
  0x28   : > { %2894 = dma.hbm_to_vmem [thread:$0]  (!%p3153_p11), %s4388_s1, 9216, %s3146_s19, [#allocation6], %s3078_s4, %s3078_s4, %s3079_s5  }
  0x29   : > { %p24_p2 = scmp.eq.s32.totalorder %s23_s23, 0  ;;  %p33_p1 = scmp.ne.s32.totalorder %s3071_s11, %s3067_s10 }
  0x2a   : > { %p34_p4 = scmp.eq.s32.totalorder %s3075_s12, 0  ;;  %p2904_p6 = scmp.lt.s32.totalorder %s3075_s12, 2 }
  0x2b   : > { %s3189_s8 = scalar_select %p24_p2, %s3071_s11, %s26_s22  }
  0x2c   : > { %p35_p8 = por %p34_p4, %p33_p1  ;;  %p4649_p10 = scmp.eq.s32.totalorder %s3123_s13, 1 }
  0x2d   : > { %s123_s18 = sand.u32 1, %s3071_s11   ;;  %s2336_s24 = sshll.u32 %s3075_s12, 9 }
  0x2e   : > { %p3193_p12 = por %p4649_p10, %p33_p1  ;;  %s2323_s25 = sshll.u32 %s123_s18, 5 }
  0x2f   : > { %s3202_s27 = scalar_lea.hbm %s4387_s0, %s2336_s24  ;;  %s127_s19 = scalar_lea.vmem [#allocation2], %s2323_s25 }
  0x30   : > { %s135_s22 = sshll.u32 %s127_s19, 4  ;;  %p3204_p11 = pnand %p2904_p6, %p35_p8  ;;  %s3208_s22 = int_to_ptr.vmem [resolvable:$true] %s135_s22 }
  0x31   : > { %s3210_s28 = scalar_lea.sflag [#allocation3], %s123_s18  ;;  %s2975_s29 = scalar_lea.hbm %s3202_s27, 512 }
  0x32   : > { %p2976_p13 = scmp.ne.s32.totalorder %s3202_s27, %s2975_s29  ;;  %p2977_p0 = pneg %p3204_p11 }
  0x33   : > { %s2980_s4 = scalar_lea.hbm %s4387_s0, 1024  ;;  %p2981_p7 = scmp.lt.u32.totalorder %s3202_s27, %s4387_s0 }
  0x34   : > { %p2978_p3 = pnand %p2977_p0, %p2976_p13  ;;  %p2982_p9 = scmp.lt.u32.totalorder %s2980_s4, %s2975_s29 }
  0x35   : > { %p2984_p1 = scmp.lt.u32.totalorder %s2975_s29, %s3202_s27 }
  0x36   : > { %p2979_p5 = pneg %p2978_p3  ;;  %p2983_p2 = por %p2982_p9, %p2981_p7 }
  0x38   : > { %p2985_p4 = por %p2984_p1, %p2983_p2 }
  0x3a   : > { %p2986_p6 = pnand %p2985_p4, %p2979_p5 }
  0x3c   : > { %2989 = shalt.err (!%p2986_p6)
}
  0x3d   : > { %s2990_s7 = scalar_lea.vmem %s3208_s22, 512  ;;  %s3080_s18 = smov [#allocation2]  }
  0x3e   : > { %p2991_p8 = scmp.ne.s32.totalorder %s3208_s22, %s2990_s7  ;;  %s2995_s24 = sshll.u32 %s3080_s18, 4  ;;  %s2996_s24 = int_to_ptr.vmem [resolvable:$false] %s2995_s24 }
  0x3f   : > { %s2997_s25 = scalar_lea.vmem %s2996_s24, 1024  ;;  %p2998_p3 = scmp.lt.s32.totalorder %s3208_s22, %s2996_s24 }
  0x40   : > { %p2993_p10 = pnand %p2991_p8, %p2977_p0  ;;  %p2999_p7 = scmp.lt.s32.totalorder %s2997_s25, %s2990_s7 }
  0x42   : > { %p2994_p13 = pneg %p2993_p10  ;;  %p3000_p9 = por %p2999_p7, %p2998_p3 }
  0x44   : > { %p3001_p2 = pnand %p3000_p9, %p2994_p13 }
  0x46   : > { %3004 = shalt.err (!%p3001_p2)
}
  0x47   : > { %s3081_s20 = smov 256   ;;  %s3082_s26 = smov 16  }
  0x48   : > { %2898 = dma.hbm_to_vmem [thread:$0]  (!%p3204_p11), %s3202_s27, 512, %s3208_s22, %s3210_s28, %s3081_s20, %s3081_s20, %s3082_s26  }
  0x49   : > { %p4652_p0 = scmp.ne.s32.totalorder %s4647_s17, 0 }
  0x4b   : > { %147 = sbr.rel (%p4652_p0) target bundleno = 643 (0x283), region = 28 }
  0x52   : > { %s3241_s19 = sand.u32 1, %s3067_s10   ;;  %p4653_p5 = scmp.ne.s32.totalorder %s4645_s15, 0 }
  0x53   : > { %s2328_s29 = sshll.u32 %s3241_s19, 5  ;;  %s150_s30 = scalar_lea.sflag [#allocation3], %s3241_s19 }
  0x54   : > { %s3245_s3 = scalar_lea.vmem [#allocation2], %s2328_s29 }
  0x55   : > { %3050 = dma.done.wait (%p4653_p5), %s150_s30, 512  }
  0x56   : > { %3052 = vsyncadd (%p4653_p5), %s150_s30, 4294966784  ;;  %p4654_p11 = scmp.eq.s32.totalorder %s3123_s13, 0 }
  0x58   : > { %3054 = dma.done.wait (%p4654_p11), [#allocation6], 9216   ;;  %p4655_p1 = pmov %p4654_p11 }
  0x59   : > { %v4397_v0 = vmov 0.0|0.0   ;;  %v185_v1 = vld [vmem:[#allocation5 + $0x8] sm:$0xff]  ;;  %v188_v2 = vld [vmem:[#allocation5 + $0x20] sm:$0xff]  ;;  %v186_v3 = vld [vmem:[#allocation5 + $0x10] sm:$0xff]  ;;  %vm256_vm0 = vcmask 523264   ;;  %s2881_s15 = smul.u32 48, %s3241_s19 }
  0x5a   : > { %3056 = vsyncadd (%p4655_p1), [#allocation6], 4294958080  ;;  %2625 = vmatprep.subr.bf16.mxu1 %v4397_v0  ;;  %v263_v4 = vand.u32 4294901760, %v185_v1  ;;  %v267_v5 = vand.u32 4294901760, %v188_v2  ;;  %v189_v6 = vld [vmem:[#allocation5 + $0x28] sm:$0xff]  ;;  %v1402_v7 = vand.u32 4294901760, %v186_v3 }
  0x5b   : > { %v184_v8 = vld [vmem:[#allocation5] sm:$0xff]  ;;  %v187_v9 = vld [vmem:[#allocation5 + $0x18] sm:$0xff]  ;;  %v1405_v10 = vand.u32 4294901760, %v189_v6  ;;  %v194_v14 = vld [vmem:[#allocation5 + $0x50] sm:$0xff]  ;;  %s177_s17 = scalar_lea.vmem [#allocation7], %s2881_s15  ;;  %s2882_s22 = smul.u32 768, %s3123_s13 }
  0x5c   : > { %v265_v11 = vand.u32 4294901760, %v184_v8  ;;  %v269_v12 = vand.u32 4294901760, %v187_v9  ;;  %v191_v13 = vld [vmem:[#allocation5 + $0x38] sm:$0xff]  ;;  %v192_v15 = vld [vmem:[#allocation5 + $0x40] sm:$0xff]  ;;  %v3256_v16 = vpack.c.bf16 %v267_v5, %v263_v4  ;;  %v3258_v17 = vsub.f32 %v185_v1, %v263_v4  ;;  %v190_v21 = vld [vmem:[#allocation5 + $0x30] sm:$0xff]  ;;  %s2236_s27 = sshll.u32 %s177_s17, 4  ;;  %s4337_s27 = int_to_ptr.vmem [resolvable:$true] %s2236_s27 }
  0x5d   : > { %v3260_v18 = vsub.f32 %v188_v2, %v267_v5  ;;  %v3262_v19 = vsub.f32 %v186_v3, %v1402_v7  ;;  %v195_v20 = vld [vmem:[#allocation5 + $0x58] sm:$0xff]  ;;  %v193_v22 = vld [vmem:[#allocation5 + $0x48] sm:$0xff]  ;;  %v3264_v23 = vpack.c.bf16 %v1405_v10, %v1402_v7  ;;  %v3266_v24 = vsub.f32 %v189_v6, %v1405_v10  ;;  %v200_v32 = vld [vmem:[#allocation5 + $0x80] sm:$0xff]  ;;  %s4342_s4 = scalar_lea.hbm %s4389_s2, %s2882_s22  ;;  %s2222_s13 = scalar_lea.sflag [#allocation4], %s3241_s19 }
  0x5e   : > { %4656 = vst [vmem:[#allocation11_spill] sm:$0xff] %v3256_v16  ;;  %4657 = vst [vmem:[#allocation12_spill] sm:$0xff] %v3258_v17  ;;  %v3268_v25 = vpack.c.bf16 %v269_v12, %v265_v11  ;;  %v3270_v26 = vsub.f32 %v184_v8, %v265_v11  ;;  %v197_v27 = vld [vmem:[#allocation5 + $0x68] sm:$0xff]  ;;  %2338 = vmatprep.subr.bf16.mxu0 %v3256_v16  ;;  %v3273_v28 = vsub.f32 %v187_v9, %v269_v12  ;;  %v198_v37 = vld [vmem:[#allocation5 + $0x70] sm:$0xff]  ;;  %s3005_s5 = scalar_lea.vmem %s4337_s27, 768  ;;  %s3084_s6 = smov [#allocation7]  }
  0x5f   : > { %4658 = vst [vmem:[#allocation13_spill] sm:$0xff] %v3260_v18  ;;  %4659 = vst [vmem:[#allocation14_spill] sm:$0xff] %v3262_v19  ;;  %v271_v29 = vand.u32 4294901760, %v191_v13  ;;  %v275_v30 = vand.u32 4294901760, %v194_v14  ;;  %v1408_v31 = vand.u32 4294901760, %v192_v15  ;;  %2627 = vmatpush1.bf16.msra.mxu1 %v3264_v23  ;;  %v1411_v33 = vand.u32 4294901760, %v195_v20  ;;  %p3006_p4 = scmp.ne.s32.totalorder %s4337_s27, %s3005_s5 }
  0x60   : > { %4660 = vst [vmem:[#allocation15_spill] sm:$0xff] %v3264_v23  ;;  %4661 = vst [vmem:[#allocation16_spill] sm:$0xff] %v3266_v24  ;;  %2340 = vmatpush1.bf16.msra.mxu0 %v3268_v25  ;;  %v273_v34 = vand.u32 4294901760, %v190_v21  ;;  %v277_v35 = vand.u32 4294901760, %v193_v22  ;;  %v279_v36 = vand.u32 4294901760, %v197_v27  ;;  %v201_v38 = vld [vmem:[#allocation5 + $0x88] sm:$0xff]  ;;  %2628 = vmatprep.subr.bf16.mxu1 %v4397_v0 }
  0x61   : > { %4662 = vst [vmem:[#allocation17_spill] sm:$0xff] %v3268_v25  ;;  %4663 = vst [vmem:[#allocation18_spill] sm:$0xff] %v3270_v26  ;;  %v3278_v39 = vpack.c.bf16 %v275_v30, %v271_v29  ;;  %v3280_v40 = vsub.f32 %v191_v13, %v271_v29  ;;  %v3282_v41 = vsub.f32 %v194_v14, %v275_v30  ;;  %v196_v43 = vld [vmem:[#allocation5 + $0x60] sm:$0xff]  ;;  %v199_v44 = vld [vmem:[#allocation5 + $0x78] sm:$0xff]  ;;  %v283_v52 = vand.u32 4294901760, %v200_v32  ;;  %p3007_p6 = pnand %p3006_p4, %p3193_p12  ;;  %s3009_s7 = sshll.u32 %s3084_s6, 4  ;;  %s3010_s7 = int_to_ptr.vmem [resolvable:$false] %s3009_s7 }
  0x62   : > { %4664 = vst [vmem:[#allocation19_spill] sm:$0xff] %v3273_v28  ;;  %v3284_v42 = vsub.f32 %v192_v15, %v1408_v31  ;;  %v203_v45 = vld [vmem:[#allocation5 + $0x98] sm:$0xff]  ;;  %v3286_v46 = vpack.c.bf16 %v1411_v33, %v1408_v31  ;;  %v3288_v47 = vsub.f32 %v195_v20, %v1411_v33  ;;  %v3290_v48 = vpack.c.bf16 %v277_v35, %v273_v34  ;;  %v206_v50 = vld [vmem:[#allocation5 + $0xb0] sm:$0xff]  ;;  %v204_v59 = vld [vmem:[#allocation5 + $0xa0] sm:$0xff]  ;;  %s3011_s18 = scalar_lea.vmem %s3010_s7, 1536  ;;  %p3012_p10 = scmp.lt.s32.totalorder %s4337_s27, %s3010_s7 }
  0x63   : > { %4665 = vst [vmem:[#allocation20_spill] sm:$0xff] %v3278_v39  ;;  %4666 = vst [vmem:[#allocation21_spill] sm:$0xff] %v3280_v40  ;;  %v3292_v49 = vsub.f32 %v190_v21, %v273_v34  ;;  %2342 = vmatprep.subr.bf16.mxu0 %v3278_v39  ;;  %v3295_v51 = vsub.f32 %v193_v22, %v277_v35  ;;  %v3297_v53 = vsub.f32 %v197_v27, %v279_v36  ;;  %v207_v60 = vld [vmem:[#allocation5 + $0xb8] sm:$0xff]  ;;  %v202_v2 = vld [vmem:[#allocation5 + $0x90] sm:$0xff]  ;;  %p3008_p8 = pneg %p3007_p6  ;;  %p3013_p13 = scmp.lt.s32.totalorder %s3011_s18, %s3005_s5 }
  0x64   : > { %4667 = vst [vmem:[#allocation22_spill] sm:$0xff] %v3282_v41  ;;  %4668 = vst [vmem:[#allocation23_spill] sm:$0xff] %v3284_v42  ;;  %v1414_v54 = vand.u32 4294901760, %v198_v37  ;;  %2630 = vmatpush1.bf16.msra.mxu1 %v3286_v46  ;;  %2344 = vmatpush1.bf16.msra.mxu0 %v3290_v48  ;;  %v1417_v55 = vand.u32 4294901760, %v201_v38  ;;  %v281_v56 = vand.u32 4294901760, %v196_v43  ;;  %v285_v57 = vand.u32 4294901760, %v199_v44 }
  0x65   : > { %4669 = vst [vmem:[#allocation24_spill] sm:$0xff] %v3286_v46  ;;  %4670 = vst [vmem:[#allocation25_spill] sm:$0xff] %v3288_v47  ;;  %v287_v58 = vand.u32 4294901760, %v203_v45  ;;  %2631 = vmatprep.subr.bf16.mxu1 %v4397_v0  ;;  %v3302_v61 = vpack.c.bf16 %v283_v52, %v279_v36  ;;  %v3304_v62 = vsub.f32 %v200_v32, %v283_v52  ;;  %v291_v1 = vand.u32 4294901760, %v206_v50  ;;  %v205_v3 = vld [vmem:[#allocation5 + $0xa8] sm:$0xff]  ;;  %v212_v9 = vld [vmem:[#allocation5 + $0xe0] sm:$0xff]  ;;  %p3014_p3 = por %p3013_p13, %p3012_p10 }
  0x66   : > { %4671 = vst [vmem:[#allocation26_spill] sm:$0xff] %v3290_v48  ;;  %4672 = vst [vmem:[#allocation27_spill] sm:$0xff] %v3292_v49  ;;  %v3306_v63 = vsub.f32 %v198_v37, %v1414_v54  ;;  %v209_v4 = vld [vmem:[#allocation5 + $0xc8] sm:$0xff]  ;;  %v3308_v5 = vpack.c.bf16 %v1417_v55, %v1414_v54  ;;  %v3310_v6 = vsub.f32 %v201_v38, %v1417_v55  ;;  %v210_v10 = vld [vmem:[#allocation5 + $0xd0] sm:$0xff]  ;;  %v1420_v20 = vand.u32 4294901760, %v204_v59 }
  0x67   : > { %4673 = vst [vmem:[#allocation28_spill] sm:$0xff] %v3295_v51  ;;  %4674 = vst [vmem:[#allocation29_spill] sm:$0xff] %v3297_v53  ;;  %v3312_v7 = vpack.c.bf16 %v285_v57, %v281_v56  ;;  %v3314_v8 = vsub.f32 %v196_v43, %v281_v56  ;;  %v213_v11 = vld [vmem:[#allocation5 + $0xe8] sm:$0xff]  ;;  %2346 = vmatprep.subr.bf16.mxu0 %v3302_v61  ;;  %v3317_v12 = vsub.f32 %v199_v44, %v285_v57  ;;  %v208_v33 = vld [vmem:[#allocation5 + $0xc0] sm:$0xff]  ;;  %p3015_p7 = pnand %p3014_p3, %p3008_p8 }
  0x68   : > { %4675 = vst [vmem:[#allocation30_spill] sm:$0xff] %v3302_v61  ;;  %4676 = vst [vmem:[#allocation31_spill] sm:$0xff] %v3304_v62  ;;  %v3319_v13 = vpack.c.bf16 %v291_v1, %v287_v58  ;;  %v3321_v14 = vsub.f32 %v203_v45, %v287_v58  ;;  %v3323_v15 = vsub.f32 %v206_v50, %v291_v1  ;;  %2633 = vmatpush1.bf16.msra.mxu1 %v3308_v5  ;;  %v211_v38 = vld [vmem:[#allocation5 + $0xd8] sm:$0xff]  ;;  %v218_v44 = vld [vmem:[#allocation5 + $0x110] sm:$0xff] }
  0x69   : > { %4677 = vst [vmem:[#allocation32_spill] sm:$0xff] %v3306_v63  ;;  %4678 = vst [vmem:[#allocation33_spill] sm:$0xff] %v3308_v5  ;;  %2348 = vmatpush1.bf16.msra.mxu0 %v3312_v7  ;;  %v1423_v21 = vand.u32 4294901760, %v207_v60  ;;  %v289_v22 = vand.u32 4294901760, %v202_v2  ;;  %v293_v27 = vand.u32 4294901760, %v205_v3  ;;  %2634 = vmatprep.subr.bf16.mxu1 %v4397_v0  ;;  %v295_v29 = vand.u32 4294901760, %v209_v4 }
  0x6a   : > { %4679 = vst [vmem:[#allocation34_spill] sm:$0xff] %v3310_v6  ;;  %4680 = vst [vmem:[#allocation35_spill] sm:$0xff] %v3312_v7  ;;  %2350 = vmatprep.subr.bf16.mxu0 %v3319_v13  ;;  %v299_v30 = vand.u32 4294901760, %v212_v9  ;;  %v1426_v31 = vand.u32 4294901760, %v210_v10  ;;  %v1429_v32 = vand.u32 4294901760, %v213_v11  ;;  %v3331_v35 = vsub.f32 %v204_v59, %v1420_v20  ;;  %v215_v43 = vld [vmem:[#allocation5 + $0xf8] sm:$0xff] }
  0x6b   : > { %4681 = vst [vmem:[#allocation36_spill] sm:$0xff] %v3319_v13  ;;  %v3329_v34 = vpack.c.bf16 %v1423_v21, %v1420_v20  ;;  %v3333_v36 = vsub.f32 %v207_v60, %v1423_v21  ;;  %v3335_v37 = vpack.c.bf16 %v293_v27, %v289_v22  ;;  %v3337_v45 = vsub.f32 %v202_v2, %v289_v22  ;;  %v216_v55 = vld [vmem:[#allocation5 + $0x100] sm:$0xff]  ;;  %v219_v56 = vld [vmem:[#allocation5 + $0x118] sm:$0xff]  ;;  %v214_v57 = vld [vmem:[#allocation5 + $0xf0] sm:$0xff] }
  0x6c   : > { %v3339_v50 = vsub.f32 %v205_v3, %v293_v27  ;;  %v3341_v52 = vpack.c.bf16 %v299_v30, %v295_v29  ;;  %v3343_v54 = vsub.f32 %v209_v4, %v295_v29  ;;  %v3347_v58 = vsub.f32 %v212_v9, %v299_v30  ;;  %v217_v21 = vld [vmem:[#allocation5 + $0x108] sm:$0xff]  ;;  %v223_v13 = vld [vmem:[#allocation5 + $0x138] sm:$0xff]  ;;  %v226_v25 = vld [vmem:[#allocation5 + $0x150] sm:$0xff] }
  0x6d   : > { %4682 = vst [vmem:[#allocation37_spill] sm:$0xff] %v3329_v34  ;;  %4683 = vst [vmem:[#allocation38_spill] sm:$0xff] %v3335_v37  ;;  %2636 = vmatpush1.bf16.msra.mxu1 %v3329_v34  ;;  %2352 = vmatpush1.bf16.msra.mxu0 %v3335_v37  ;;  %v3349_v59 = vpack.c.bf16 %v1429_v32, %v1426_v31  ;;  %v3351_v60 = vsub.f32 %v210_v10, %v1426_v31  ;;  %v297_v1 = vand.u32 4294901760, %v208_v33  ;;  %v221_v30 = vld [vmem:[#allocation5 + $0x128] sm:$0xff]  ;;  %v224_v37 = vld [vmem:[#allocation5 + $0x140] sm:$0xff] }
  0x6e   : > { %4684 = vst [vmem:[#allocation39_spill] sm:$0xff] %v3341_v52  ;;  %2637 = vmatprep.subr.bf16.mxu1 %v4397_v0  ;;  %2354 = vmatprep.subr.bf16.mxu0 %v3341_v52  ;;  %v3355_v2 = vsub.f32 %v213_v11, %v1429_v32  ;;  %v301_v3 = vand.u32 4294901760, %v211_v38  ;;  %v303_v4 = vand.u32 4294901760, %v215_v43  ;;  %v307_v20 = vand.u32 4294901760, %v218_v44  ;;  %v222_v10 = vld [vmem:[#allocation5 + $0x130] sm:$0xff]  ;;  %v225_v32 = vld [vmem:[#allocation5 + $0x148] sm:$0xff] }
  0x6f   : > { %4685 = vst [vmem:[#allocation40_spill] sm:$0xff] %v3349_v59  ;;  %v3357_v22 = vsub.f32 %v208_v33, %v297_v1  ;;  %v1432_v27 = vand.u32 4294901760, %v216_v55  ;;  %v1435_v9 = vand.u32 4294901760, %v219_v56  ;;  %v305_v29 = vand.u32 4294901760, %v214_v57  ;;  %v220_v52 = vld [vmem:[#allocation5 + $0x120] sm:$0xff]  ;;  %v227_v46 = vld [vmem:[#allocation5 + $0x158] sm:$0xff] }
  0x70   : > { %v3359_v31 = vpack.c.bf16 %v301_v3, %v297_v1  ;;  %v3361_v34 = vsub.f32 %v211_v38, %v301_v3  ;;  %v3363_v0 = vpack.c.bf16 %v307_v20, %v303_v4  ;;  %v3365_v11 = vsub.f32 %v215_v43, %v303_v4  ;;  %v231_v39 = vld [vmem:[#allocation5 + $0x178] sm:$0xff] }
  0x71   : > { %2639 = vmatpush1.bf16.msra.mxu1 %v3349_v59  ;;  %v3368_v33 = vsub.f32 %v218_v44, %v307_v20  ;;  %v3370_v7 = vpack.c.bf16 %v1435_v9, %v1432_v27  ;;  %v3372_v5 = vsub.f32 %v216_v55, %v1432_v27  ;;  %v3374_v61 = vsub.f32 %v219_v56, %v1435_v9  ;;  %v230_v55 = vld [vmem:[#allocation5 + $0x170] sm:$0xff] }
  0x72   : > { %4686 = vst [vmem:[#allocation41_spill] sm:$0xff] %v3359_v31  ;;  %4687 = vst [vmem:[#allocation42_spill] sm:$0xff] %v3361_v34  ;;  %2356 = vmatpush1.bf16.msra.mxu0 %v3359_v31  ;;  %v4694_v38 = vmov 0.0|0.0   ;;  %v309_v1 = vand.u32 4294901760, %v217_v21  ;;  %v3378_v43 = vsub.f32 %v214_v57, %v305_v29  ;;  %v311_v3 = vand.u32 4294901760, %v221_v30  ;;  %v228_v57 = vld [vmem:[#allocation5 + $0x160] sm:$0xff] }
  0x73   : > { %4688 = vst [vmem:[#allocation43_spill] sm:$0xff] %v3363_v0  ;;  %4689 = vst [vmem:[#allocation44_spill] sm:$0xff] %v3365_v11  ;;  %2640 = vmatprep.subr.bf16.mxu1 %v4694_v38  ;;  %v315_v4 = vand.u32 4294901760, %v224_v37  ;;  %2358 = vmatprep.subr.bf16.mxu0 %v3363_v0  ;;  %v1438_v59 = vand.u32 4294901760, %v222_v10  ;;  %v1441_v44 = vand.u32 4294901760, %v225_v32  ;;  %v313_v20 = vand.u32 4294901760, %v220_v52 }
  0x74   : > { %4690 = vst [vmem:[#allocation45_spill] sm:$0xff] %v3368_v33  ;;  %4691 = vst [vmem:[#allocation46_spill] sm:$0xff] %v3370_v7  ;;  %v317_v48 = vand.u32 4294901760, %v223_v13  ;;  %v3381_v27 = vpack.c.bf16 %v309_v1, %v305_v29  ;;  %v3383_v56 = vsub.f32 %v217_v21, %v309_v1  ;;  %v3387_v31 = vsub.f32 %v221_v30, %v311_v3  ;;  %v229_v29 = vld [vmem:[#allocation5 + $0x168] sm:$0xff]  ;;  %v236_v1 = vld [vmem:[#allocation5 + $0x1a0] sm:$0xff] }
  0x75   : > { %4692 = vst [vmem:[#allocation47_spill] sm:$0xff] %v3372_v5  ;;  %4693 = vst [vmem:[#allocation48_spill] sm:$0xff] %v3374_v61  ;;  %v3385_v9 = vpack.c.bf16 %v315_v4, %v311_v3  ;;  %2642 = vmatpush1.bf16.msra.mxu1 %v3370_v7  ;;  %v3390_v0 = vsub.f32 %v224_v37, %v315_v4  ;;  %v3392_v23 = vpack.c.bf16 %v1441_v44, %v1438_v59  ;;  %v233_v21 = vld [vmem:[#allocation5 + $0x188] sm:$0xff]  ;;  %v244_v61 = vld [vmem:[#allocation5 + $0x1e0] sm:$0xff] }
  0x76   : > { %4695 = vst [vmem:[#allocation49_spill] sm:$0xff] %v3378_v43  ;;  %4696 = vst [vmem:[#allocation50_spill] sm:$0xff] %v3381_v27  ;;  %v3394_v16 = vsub.f32 %v222_v10, %v1438_v59  ;;  %v3396_v43 = vsub.f32 %v225_v32, %v1441_v44  ;;  %2360 = vmatpush1.bf16.msra.mxu0 %v3381_v27  ;;  %2643 = vmatprep.subr.bf16.mxu1 %v4694_v38  ;;  %v319_v37 = vand.u32 4294901760, %v227_v46  ;;  %v234_v44 = vld [vmem:[#allocation5 + $0x190] sm:$0xff] }
  0x77   : > { %4697 = vst [vmem:[#allocation51_spill] sm:$0xff] %v3383_v56  ;;  %4698 = vst [vmem:[#allocation52_spill] sm:$0xff] %v3385_v9  ;;  %v3400_v30 = vpack.c.bf16 %v317_v48, %v313_v20  ;;  %v3402_v3 = vsub.f32 %v220_v52, %v313_v20  ;;  %v3404_v7 = vsub.f32 %v223_v13, %v317_v48  ;;  %2362 = vmatprep.subr.bf16.mxu0 %v3385_v9  ;;  %v232_v9 = vld [vmem:[#allocation5 + $0x180] sm:$0xff] }
  0x78   : > { %4699 = vst [vmem:[#allocation53_spill] sm:$0xff] %v3387_v31  ;;  %4700 = vst [vmem:[#allocation54_spill] sm:$0xff] %v3390_v0  ;;  %v323_v59 = vand.u32 4294901760, %v230_v55  ;;  %v1444_v10 = vand.u32 4294901760, %v228_v57  ;;  %v1447_v32 = vand.u32 4294901760, %v231_v39  ;;  %v321_v4 = vand.u32 4294901760, %v226_v25 }
  0x79   : > { %4701 = vst [vmem:[#allocation55_spill] sm:$0xff] %v3392_v23  ;;  %4702 = vst [vmem:[#allocation56_spill] sm:$0xff] %v3394_v16  ;;  %v325_v16 = vand.u32 4294901760, %v229_v29  ;;  %v327_v27 = vand.u32 4294901760, %v233_v21  ;;  %v331_v0 = vand.u32 4294901760, %v236_v1  ;;  %v237_v31 = vld [vmem:[#allocation5 + $0x1a8] sm:$0xff]  ;;  %2645 = vmatpush1.bf16.msra.mxu1 %v3392_v23 }
  0x7a   : > { %4703 = vst [vmem:[#allocation57_spill] sm:$0xff] %v3396_v43  ;;  %4704 = vst [vmem:[#allocation58_spill] sm:$0xff] %v3400_v30  ;;  %v3407_v43 = vsub.f32 %v227_v46, %v319_v37  ;;  %v3410_v52 = vpack.c.bf16 %v323_v59, %v319_v37  ;;  %v3412_v48 = vsub.f32 %v230_v55, %v323_v59  ;;  %2364 = vmatpush1.bf16.msra.mxu0 %v3400_v30  ;;  %v242_v55 = vld [vmem:[#allocation5 + $0x1d0] sm:$0xff]  ;;  %v240_v59 = vld [vmem:[#allocation5 + $0x1c0] sm:$0xff] }
  0x7b   : > { %4705 = vst [vmem:[#allocation59_spill] sm:$0xff] %v3402_v3  ;;  %4706 = vst [vmem:[#allocation60_spill] sm:$0xff] %v3404_v7  ;;  %v3414_v13 = vpack.c.bf16 %v1447_v32, %v1444_v10  ;;  %v3416_v20 = vsub.f32 %v228_v57, %v1444_v10  ;;  %v235_v7 = vld [vmem:[#allocation5 + $0x198] sm:$0xff]  ;;  %2646 = vmatprep.subr.bf16.mxu1 %v4694_v38  ;;  %v3420_v46 = vsub.f32 %v231_v39, %v1447_v32  ;;  %v238_v39 = vld [vmem:[#allocation5 + $0x1b0] sm:$0xff] }
  0x7c   : > { %4707 = vst [vmem:[#allocation61_spill] sm:$0xff] %v3407_v43  ;;  %4708 = vst [vmem:[#allocation62_spill] sm:$0xff] %v3410_v52  ;;  %v239_v3 = vld [vmem:[#allocation5 + $0x1b8] sm:$0xff]  ;;  %v3422_v43 = vpack.c.bf16 %v325_v16, %v321_v4  ;;  %v3424_v23 = vsub.f32 %v226_v25, %v321_v4  ;;  %v1450_v37 = vand.u32 4294901760, %v234_v44  ;;  %2366 = vmatprep.subr.bf16.mxu0 %v3410_v52  ;;  %v1453_v32 = vand.u32 4294901760, %v237_v31 }
  0x7d   : > { %4709 = vst [vmem:[#allocation63_spill] sm:$0xff] %v3412_v48  ;;  %4710 = vst [vmem:[#allocation64_spill] sm:$0xff] %v3414_v13  ;;  %v243_v48 = vld [vmem:[#allocation5 + $0x1d8] sm:$0xff]  ;;  %v3427_v57 = vsub.f32 %v229_v29, %v325_v16  ;;  %v3429_v10 = vpack.c.bf16 %v331_v0, %v327_v27  ;;  %v3433_v30 = vsub.f32 %v236_v1, %v331_v0  ;;  %v329_v25 = vand.u32 4294901760, %v232_v9  ;;  %v241_v29 = vld [vmem:[#allocation5 + $0x1c8] sm:$0xff] }
  0x7e   : > { %4711 = vst [vmem:[#allocation65_spill] sm:$0xff] %v3416_v20  ;;  %4712 = vst [vmem:[#allocation66_spill] sm:$0xff] %v3420_v46  ;;  %v3431_v20 = vsub.f32 %v233_v21, %v327_v27  ;;  %v3435_v46 = vsub.f32 %v234_v44, %v1450_v37  ;;  %v333_v4 = vand.u32 4294901760, %v235_v7  ;;  %2648 = vmatpush1.bf16.msra.mxu1 %v3414_v13  ;;  %v339_v56 = vand.u32 4294901760, %v242_v55  ;;  %v245_v44 = vld [vmem:[#allocation5 + $0x1e8] sm:$0xff] }
  0x7f   : > { %4713 = vst [vmem:[#allocation67_spill] sm:$0xff] %v3422_v43  ;;  %4714 = vst [vmem:[#allocation68_spill] sm:$0xff] %v3424_v23  ;;  %v335_v23 = vand.u32 4294901760, %v239_v3  ;;  %v1456_v52 = vand.u32 4294901760, %v240_v59  ;;  %v1459_v16 = vand.u32 4294901760, %v243_v48  ;;  %2368 = vmatpush1.bf16.msra.mxu0 %v3422_v43  ;;  %2649 = vmatprep.subr.bf16.mxu1 %v4694_v38  ;;  %v3440_v0 = vpack.c.bf16 %v1453_v32, %v1450_v37  ;;  %v249_v37 = vld [vmem:[#allocation5 + $0x208] sm:$0xff] }
  0x80   : > { %4715 = vst [vmem:[#allocation69_spill] sm:$0xff] %v3427_v57  ;;  %4716 = vst [vmem:[#allocation70_spill] sm:$0xff] %v3429_v10  ;;  %v3442_v27 = vsub.f32 %v237_v31, %v1453_v32  ;;  %v3444_v21 = vpack.c.bf16 %v333_v4, %v329_v25  ;;  %v337_v1 = vand.u32 4294901760, %v238_v39  ;;  %2370 = vmatprep.subr.bf16.mxu0 %v3429_v10  ;;  %v247_v31 = vld [vmem:[#allocation5 + $0x1f8] sm:$0xff] }
  0x81   : > { %4717 = vst [vmem:[#allocation71_spill] sm:$0xff] %v3431_v20  ;;  %4718 = vst [vmem:[#allocation72_spill] sm:$0xff] %v3433_v30  ;;  %v246_v30 = vld [vmem:[#allocation5 + $0x1f0] sm:$0xff]  ;;  %v3447_v13 = vsub.f32 %v232_v9, %v329_v25  ;;  %v3449_v20 = vsub.f32 %v235_v7, %v333_v4  ;;  %v3451_v57 = vpack.c.bf16 %v339_v56, %v335_v23  ;;  %v341_v9 = vand.u32 4294901760, %v241_v29  ;;  %v255_v10 = vld [vmem:[#allocation5 + $0x238] sm:$0xff] }
  0x82   : > { %4719 = vst [vmem:[#allocation73_spill] sm:$0xff] %v3435_v46  ;;  %4720 = vst [vmem:[#allocation74_spill] sm:$0xff] %v3440_v0  ;;  %v248_v46 = vld [vmem:[#allocation5 + $0x200] sm:$0xff]  ;;  %v3453_v43 = vsub.f32 %v239_v3, %v335_v23  ;;  %v3455_v32 = vsub.f32 %v242_v55, %v339_v56  ;;  %v3459_v5 = vsub.f32 %v240_v59, %v1456_v52  ;;  %2651 = vmatpush1.bf16.msra.mxu1 %v3440_v0  ;;  %v254_v59 = vld [vmem:[#allocation5 + $0x230] sm:$0xff] }
  0x83   : > { %4721 = vst [vmem:[#allocation75_spill] sm:$0xff] %v3442_v27  ;;  %4722 = vst [vmem:[#allocation76_spill] sm:$0xff] %v3444_v21  ;;  %v3457_v27 = vpack.c.bf16 %v1459_v16, %v1456_v52  ;;  %v3461_v33 = vsub.f32 %v243_v48, %v1459_v16  ;;  %v3464_v7 = vsub.f32 %v238_v39, %v337_v1  ;;  %v343_v25 = vand.u32 4294901760, %v245_v44  ;;  %v251_v52 = vld [vmem:[#allocation5 + $0x218] sm:$0xff] }
  0x84   : > { %4723 = vst [vmem:[#allocation77_spill] sm:$0xff] %v3449_v20  ;;  %4724 = vst [vmem:[#allocation78_spill] sm:$0xff] %v3451_v57  ;;  %v347_v4 = vand.u32 4294901760, %v248_v46  ;;  %2372 = vmatpush1.bf16.msra.mxu0 %v3444_v21  ;;  %2652 = vmatprep.subr.bf16.mxu1 %v4694_v38  ;;  %v1462_v23 = vand.u32 4294901760, %v246_v30  ;;  %v1465_v56 = vand.u32 4294901760, %v249_v37  ;;  %v345_v3 = vand.u32 4294901760, %v244_v61 }
  0x85   : > { %4725 = vst [vmem:[#allocation79_spill] sm:$0xff] %v3453_v43  ;;  %4726 = vst [vmem:[#allocation80_spill] sm:$0xff] %v3455_v32  ;;  %v349_v55 = vand.u32 4294901760, %v247_v31  ;;  %2374 = vmatprep.subr.bf16.mxu0 %v3451_v57  ;;  %v3469_v48 = vpack.c.bf16 %v341_v9, %v337_v1  ;;  %v3471_v16 = vsub.f32 %v241_v29, %v341_v9  ;;  %v252_v21 = vld [vmem:[#allocation5 + $0x220] sm:$0xff]  ;;  %v253_v57 = vld [vmem:[#allocation5 + $0x228] sm:$0xff] }
  0x86   : > { %4727 = vst [vmem:[#allocation81_spill] sm:$0xff] %v3457_v27  ;;  %4728 = vst [vmem:[#allocation82_spill] sm:$0xff] %v3459_v5  ;;  %v3473_v39 = vpack.c.bf16 %v347_v4, %v343_v25  ;;  %v3475_v0 = vsub.f32 %v245_v44, %v343_v25  ;;  %v3479_v5 = vpack.c.bf16 %v1465_v56, %v1462_v23  ;;  %v181_v1 = vld [vmem:[%s3245_s3 + $0x8] sm:$0xff]  ;;  %2654 = vmatpush1.bf16.msra.mxu1 %v3457_v27 }
  0x87   : > { %4729 = vst [vmem:[#allocation83_spill] sm:$0xff] %v3461_v33  ;;  %4730 = vst [vmem:[#allocation84_spill] sm:$0xff] %v3464_v7  ;;  %v250_v7 = vld [vmem:[#allocation5 + $0x210] sm:$0xff]  ;;  %v3477_v33 = vsub.f32 %v248_v46, %v347_v4  ;;  %v3481_v32 = vsub.f32 %v246_v30, %v1462_v23  ;;  %v3483_v43 = vsub.f32 %v249_v37, %v1465_v56  ;;  %v351_v25 = vand.u32 4294901760, %v251_v52 }
  0x88   : > { %4731 = vst [vmem:[#allocation85_spill] sm:$0xff] %v3469_v48  ;;  %4732 = vst [vmem:[#allocation86_spill] sm:$0xff] %v3471_v16  ;;  %v3487_v29 = vpack.c.bf16 %v349_v55, %v345_v3  ;;  %v3489_v44 = vsub.f32 %v244_v61, %v345_v3  ;;  %v3491_v9 = vsub.f32 %v247_v31, %v349_v55  ;;  %2376 = vmatpush1.bf16.msra.mxu0 %v3469_v48  ;;  %v180_v31 = vld [vmem:[%s3245_s3] sm:$0xff] }
  0x89   : > { %4733 = vst [vmem:[#allocation87_spill] sm:$0xff] %v3473_v39  ;;  %4734 = vst [vmem:[#allocation88_spill] sm:$0xff] %v3475_v0  ;;  %2655 = vmatprep.subr.bf16.mxu1 %v4694_v38  ;;  %v355_v30 = vand.u32 4294901760, %v254_v59  ;;  %v1468_v46 = vand.u32 4294901760, %v252_v21  ;;  %v1471_v37 = vand.u32 4294901760, %v255_v10  ;;  %v353_v4 = vand.u32 4294901760, %v250_v7  ;;  %2378 = vmatprep.subr.bf16.mxu0 %v3473_v39 }
  0x8a   : > { %4735 = vst [vmem:[#allocation89_spill] sm:$0xff] %v3477_v33  ;;  %4736 = vst [vmem:[#allocation90_spill] sm:$0xff] %v3479_v5  ;;  %v3496_v23 = vsub.f32 %v251_v52, %v351_v25  ;;  %v357_v56 = vand.u32 4294901760, %v253_v57  ;;  %v258_v27 = vsel %vm256_vm0, %v181_v1, 0  ;;  %v4485_v61 = vand.u32 4294901760, %v3258_v17  ;;  %2657 = vmatpush1.bf16.msra.mxu1 %v3479_v5 }
  0x8b   : > { %4737 = vst [vmem:[#allocation91_spill] sm:$0xff] %v3487_v29  ;;  %4738 = vst [vmem:[#allocation92_spill] sm:$0xff] %v3489_v44  ;;  %v3501_v3 = vpack.c.bf16 %v355_v30, %v351_v25  ;;  %v3503_v55 = vsub.f32 %v254_v59, %v355_v30  ;;  %v3505_v48 = vpack.c.bf16 %v1471_v37, %v1468_v46  ;;  %2658 = vmatprep.subr.bf16.mxu1 %v4694_v38 }
  0x8c   : > { %4739 = vst [vmem:[#allocation93_spill] sm:$0xff] %v3491_v9  ;;  %v3507_v9 = vsub.f32 %v252_v21, %v1468_v46  ;;  %v3510_v44 = vsub.f32 %v255_v10, %v1471_v37  ;;  %v3512_v52 = vpack.c.bf16 %v357_v56, %v353_v4  ;;  %v3514_v39 = vsub.f32 %v250_v7, %v353_v4 }
  0x8d   : > { %4740 = vst [vmem:[#allocation94_spill] sm:$0xff] %v3501_v3  ;;  %4741 = vst [vmem:[#allocation95_spill] sm:$0xff] %v3505_v48  ;;  %v3516_v1 = vsub.f32 %v253_v57, %v357_v56  ;;  %2380 = vmatpush1.bf16.msra.mxu0 %v3487_v29  ;;  %v3520_v59 = vand.u32 4294901760, %v258_v27  ;;  %v411_v21 = vsub.f32 %v3258_v17, %v4485_v61  ;;  %v4488_v25 = vand.u32 4294901760, %v3260_v18 }
  0x8e   : > { %4742 = vst [vmem:[#allocation96_spill] sm:$0xff] %v3510_v44  ;;  %4743 = vst [vmem:[#allocation97_spill] sm:$0xff] %v3512_v52  ;;  %v3526_v10 = vand.u32 4294901760, %v180_v31  ;;  %2382 = vmatprep.subr.bf16.mxu0 %v3501_v3  ;;  %v4489_v7 = vand.u32 4294901760, %v3262_v19  ;;  %2660 = vmatpush1.bf16.msra.mxu1 %v3505_v48  ;;  %v4750_v30 = vand.u32 4294901760, %v3266_v24  ;;  %v4752_v3 = vand.u32 4294901760, %v3273_v28 }
  0x8f   : > { %4744 = vst [vmem:[#allocation98_spill] sm:$0xff] %v3514_v39  ;;  %4745 = vst [vmem:[#allocation99_spill] sm:$0xff] %v3516_v1  ;;  %v3534_v37 = vsub.f32 %v258_v27, %v3520_v59  ;;  %v412_v4 = vand.u32 4294901760, %v411_v21  ;;  %v423_v56 = vsub.f32 %v3260_v18, %v4488_v25  ;;  %v4751_v27 = vand.u32 4294901760, %v3270_v26  ;;  %2661 = vmatprep.subr.bf16.mxu1 %v4694_v38 }
  0x90   : > { %4746 = vst [vmem:[#allocation100_spill] sm:$0xff] %v3520_v59  ;;  %4747 = vst [vmem:[#allocation101_spill] sm:$0xff] %v3526_v10  ;;  %v3540_v61 = vsub.f32 %v180_v31, %v3526_v10  ;;  %v1524_v57 = vsub.f32 %v3262_v19, %v4489_v7  ;;  %v1531_v46 = vsub.f32 %v3266_v24, %v4750_v30  ;;  %v4515_v30 = vand.u32 4294901760, %v3280_v40 }
  0x91   : > { %4748 = vst [vmem:[#allocation102_spill] sm:$0xff] %v3534_v37  ;;  %v417_v21 = vsub.f32 %v3270_v26, %v4751_v27  ;;  %v429_v25 = vsub.f32 %v3273_v28, %v4752_v3  ;;  %2384 = vmatpush1.bf16.msra.mxu0 %v3512_v52  ;;  %v3557_v31 = vand.u32 4294901760, %v3534_v37  ;;  %v424_v7 = vand.u32 4294901760, %v423_v56 }
  0x92   : > { %4749 = vst [vmem:[#allocation103_spill] sm:$0xff] %v3540_v61  ;;  %v3561_v48 = vand.u32 4294901760, %v3540_v61  ;;  %v1525_v29 = vand.u32 4294901760, %v1524_v57  ;;  %v1532_v5 = vand.u32 4294901760, %v1531_v46  ;;  %v435_v56 = vsub.f32 %v3280_v40, %v4515_v30 }
  0x93   : > { %4753 = vst [vmem:[#allocation104_spill] sm:$0xff] %v3557_v31  ;;  %v418_v27 = vand.u32 4294901760, %v417_v21  ;;  %v430_v10 = vand.u32 4294901760, %v429_v25  ;;  %v378_v3 = vsub.f32 %v3534_v37, %v3557_v31  ;;  %v2385_v59 = vpack.c.bf16 %v424_v7, %v412_v4 }
  0x94   : > { %4754 = vst [vmem:[#allocation105_spill] sm:$0xff] %v3561_v48  ;;  %v384_v52 = vsub.f32 %v3540_v61, %v3561_v48  ;;  %v2662_v28 = vpack.c.bf16 %v1532_v5, %v1525_v29  ;;  %v4512_v24 = vand.u32 4294901760, %v3282_v41  ;;  %v4510_v57 = vand.u32 4294901760, %v3284_v42 }
  0x95   : > { %v2387_v26 = vpack.c.bf16 %v430_v10, %v418_v27  ;;  %v379_v46 = vand.u32 4294901760, %v378_v3  ;;  %2386 = vmatprep.subr.bf16.mxu0 %v2385_v59  ;;  %v436_v21 = vand.u32 4294901760, %v435_v56  ;;  %v4511_v31 = vand.u32 4294901760, %v3288_v47 }
  0x96   : > { %v385_v25 = vand.u32 4294901760, %v384_v52  ;;  %v447_v7 = vsub.f32 %v3282_v41, %v4512_v24  ;;  %v1538_v4 = vsub.f32 %v3284_v42, %v4510_v57  ;;  %v4513_v5 = vand.u32 4294901760, %v3292_v49 }
  0x97   : > { %v4514_v29 = vand.u32 4294901760, %v3295_v51  ;;  %1494 = vmatprep.mubr.f32.mxu1 %v379_v46  ;;  %380 = vmatprep.mubr.f32.mxu0 %v379_v46  ;;  %v1545_v52 = vsub.f32 %v3288_v47, %v4511_v31  ;;  %v4518_v59 = vand.u32 4294901760, %v3297_v53  ;;  %v4519_v10 = vand.u32 4294901760, %v3304_v62 }
  0x98   : > { %v4522_v27 = vand.u32 4294901760, %v3306_v63  ;;  %1500 = vmatmul.mubr.f32.vlgmr.msra.gmra.mrb[0].mxu1 %v385_v25  ;;  %386 = vmatmul.mubr.f32.vlgmr.msra.gmra.mrb[0].mxu0 %v385_v25  ;;  %v448_v3 = vand.u32 4294901760, %v447_v7  ;;  %v1539_v56 = vand.u32 4294901760, %v1538_v4  ;;  %v441_v57 = vsub.f32 %v3292_v49, %v4513_v5 }
  0x99   : > { %v453_v46 = vsub.f32 %v3295_v51, %v4514_v29  ;;  %2663 = vmatpush1.bf16.msra.mxu1 %v2662_v28  ;;  %2388 = vmatpush1.bf16.msra.mxu0 %v2387_v26  ;;  %v1546_v31 = vand.u32 4294901760, %v1545_v52  ;;  %v459_v24 = vsub.f32 %v3297_v53, %v4518_v59  ;;  %v471_v25 = vsub.f32 %v3304_v62, %v4519_v10 }
  0x9a   : > { %v1552_v7 = vsub.f32 %v3306_v63, %v4522_v27  ;;  %2664 = vmatprep.subr.bf16.mxu1 %v4694_v38  ;;  %v2389_v4 = vpack.c.bf16 %v448_v3, %v436_v21  ;;  %v442_v5 = vand.u32 4294901760, %v441_v57  ;;  %v4523_v26 = vand.u32 4294901760, %v3310_v6 }
  0x9b   : > { %v454_v29 = vand.u32 4294901760, %v453_v46  ;;  %v2665_v28 = vpack.c.bf16 %v1546_v31, %v1539_v56  ;;  %v460_v52 = vand.u32 4294901760, %v459_v24  ;;  %v472_v30 = vand.u32 4294901760, %v471_v25 }
  0x9c   : > { %v1553_v48 = vand.u32 4294901760, %v1552_v7  ;;  %2390 = vmatprep.subr.bf16.mxu0 %v2389_v4  ;;  %v1559_v10 = vsub.f32 %v3310_v6, %v4523_v26  ;;  %v4535_v61 = vand.u32 4294901760, %v3314_v8  ;;  %v4526_v27 = vand.u32 4294901760, %v3317_v12 }
  0x9d   : > { %v2391_v59 = vpack.c.bf16 %v454_v29, %v442_v5  ;;  %2666 = vmatpush1.bf16.msra.mxu1 %v2665_v28  ;;  %v2393_v21 = vpack.c.bf16 %v472_v30, %v460_v52  ;;  %v4525_v57 = vand.u32 4294901760, %v3321_v14  ;;  %v4524_v3 = vand.u32 4294901760, %v3323_v15 }
  0x9e   : > { %v4527_v24 = vand.u32 4294901760, %v3331_v35  ;;  %2667 = vmatprep.subr.bf16.mxu1 %v4694_v38  ;;  %v1560_v31 = vand.u32 4294901760, %v1559_v10  ;;  %v465_v5 = vsub.f32 %v3314_v8, %v4535_v61  ;;  %v477_v29 = vsub.f32 %v3317_v12, %v4526_v27 }
  0x9f   : > { %2392 = vmatpush1.bf16.msra.mxu0 %v2391_v59  ;;  %v4534_v30 = vand.u32 4294901760, %v3333_v36  ;;  %v483_v56 = vsub.f32 %v3321_v14, %v4525_v57  ;;  %v495_v59 = vsub.f32 %v3323_v15, %v4524_v3  ;;  %v4533_v46 = vand.u32 4294901760, %v3337_v45 }
  0xa0   : > { %2394 = vmatprep.subr.bf16.mxu0 %v2393_v21  ;;  %v1566_v10 = vsub.f32 %v3331_v35, %v4527_v24  ;;  %v2668_v25 = vpack.c.bf16 %v1560_v31, %v1553_v48  ;;  %v466_v7 = vand.u32 4294901760, %v465_v5  ;;  %v478_v4 = vand.u32 4294901760, %v477_v29 }
  0xa1   : > { %v1573_v28 = vsub.f32 %v3333_v36, %v4534_v30  ;;  %v484_v52 = vand.u32 4294901760, %v483_v56  ;;  %v496_v21 = vand.u32 4294901760, %v495_v59  ;;  %v489_v3 = vsub.f32 %v3337_v45, %v4533_v46 }
  0xa2   : > { %v1567_v26 = vand.u32 4294901760, %v1566_v10  ;;  %2669 = vmatpush1.bf16.msra.mxu1 %v2668_v25  ;;  %v2395_v57 = vpack.c.bf16 %v478_v4, %v466_v7  ;;  %v4532_v24 = vand.u32 4294901760, %v3339_v50  ;;  %v4531_v48 = vand.u32 4294901760, %v3343_v54 }
  0xa3   : > { %v1574_v27 = vand.u32 4294901760, %v1573_v28  ;;  %2670 = vmatprep.subr.bf16.mxu1 %v4694_v38  ;;  %v2397_v31 = vpack.c.bf16 %v496_v21, %v484_v52  ;;  %v490_v5 = vand.u32 4294901760, %v489_v3  ;;  %v4528_v29 = vand.u32 4294901760, %v3347_v58 }
  0xa4   : > { %v4529_v56 = vand.u32 4294901760, %v3351_v60  ;;  %2396 = vmatpush1.bf16.msra.mxu0 %v2395_v57  ;;  %v501_v10 = vsub.f32 %v3339_v50, %v4532_v24  ;;  %v507_v25 = vsub.f32 %v3343_v54, %v4531_v48  ;;  %v4530_v7 = vand.u32 4294901760, %v3355_v2  ;;  %v4755_v48 = vld [vmem:[#allocation45_spill] sm:$0xff] }
  0xa5   : > { %v2671_v59 = vpack.c.bf16 %v1574_v27, %v1567_v26  ;;  %2398 = vmatprep.subr.bf16.mxu0 %v2397_v31  ;;  %v519_v3 = vsub.f32 %v3347_v58, %v4528_v29  ;;  %v4538_v27 = vand.u32 4294901760, %v3357_v22  ;;  %v4539_v26 = vand.u32 4294901760, %v3361_v34 }
  0xa6   : > { %v1580_v57 = vsub.f32 %v3351_v60, %v4529_v56  ;;  %v502_v4 = vand.u32 4294901760, %v501_v10  ;;  %v508_v28 = vand.u32 4294901760, %v507_v25  ;;  %v1587_v52 = vsub.f32 %v3355_v2, %v4530_v7 }
  0xa7   : > { %2672 = vmatpush1.bf16.msra.mxu1 %v2671_v59  ;;  %v4540_v21 = vand.u32 4294901760, %v3365_v11  ;;  %v520_v31 = vand.u32 4294901760, %v519_v3  ;;  %v513_v56 = vsub.f32 %v3357_v22, %v4538_v27  ;;  %v525_v59 = vsub.f32 %v3361_v34, %v4539_v26 }
  0xa8   : > { %2673 = vmatprep.subr.bf16.mxu1 %v4694_v38  ;;  %v1581_v29 = vand.u32 4294901760, %v1580_v57  ;;  %v2399_v10 = vpack.c.bf16 %v502_v4, %v490_v5  ;;  %v1588_v25 = vand.u32 4294901760, %v1587_v52  ;;  %v4541_v24 = vand.u32 4294901760, %v4755_v48  ;;  %v4756_v57 = vld [vmem:[#allocation47_spill] sm:$0xff]  ;;  %v4757_v5 = vld [vmem:[#allocation48_spill] sm:$0xff] }
  0xa9   : > { %v531_v7 = vsub.f32 %v3365_v11, %v4540_v21  ;;  %v2401_v46 = vpack.c.bf16 %v520_v31, %v508_v28  ;;  %v514_v30 = vand.u32 4294901760, %v513_v56  ;;  %v526_v3 = vand.u32 4294901760, %v525_v59  ;;  %v4758_v28 = vld [vmem:[#allocation49_spill] sm:$0xff]  ;;  %v4759_v31 = vld [vmem:[#allocation51_spill] sm:$0xff] }
  0xaa   : > { %v4543_v61 = vand.u32 4294901760, %v4756_v57  ;;  %2400 = vmatpush1.bf16.msra.mxu0 %v2399_v10  ;;  %v2674_v37 = vpack.c.bf16 %v1588_v25, %v1581_v29  ;;  %v543_v26 = vsub.f32 %v4755_v48, %v4541_v24  ;;  %v4544_v4 = vand.u32 4294901760, %v4757_v5  ;;  %v4761_v24 = vld [vmem:[#allocation54_spill] sm:$0xff] }
  0xab   : > { %v532_v27 = vand.u32 4294901760, %v531_v7  ;;  %2402 = vmatprep.subr.bf16.mxu0 %v2401_v46  ;;  %v2403_v52 = vpack.c.bf16 %v526_v3, %v514_v30  ;;  %v4549_v56 = vand.u32 4294901760, %v4758_v28  ;;  %v4550_v59 = vand.u32 4294901760, %v4759_v31  ;;  %v4760_v7 = vld [vmem:[#allocation53_spill] sm:$0xff] }
  0xac   : > { %v1594_v21 = vsub.f32 %v4756_v57, %v4543_v61  ;;  %2675 = vmatpush1.bf16.msra.mxu1 %v2674_v37  ;;  %v544_v10 = vand.u32 4294901760, %v543_v26  ;;  %v1601_v29 = vsub.f32 %v4757_v5, %v4544_v4  ;;  %v4555_v25 = vand.u32 4294901760, %v4760_v7  ;;  %v4762_v26 = vld [vmem:[#allocation56_spill] sm:$0xff] }
  0xad   : > { %2676 = vmatprep.subr.bf16.mxu1 %v4694_v38  ;;  %v537_v46 = vsub.f32 %v4758_v28, %v4549_v56  ;;  %v549_v37 = vsub.f32 %v4759_v31, %v4550_v59  ;;  %v4557_v3 = vand.u32 4294901760, %v4762_v26  ;;  %v4763_v5 = vand.u32 4294901760, %v4761_v24  ;;  %v4764_v59 = vld [vmem:[#allocation57_spill] sm:$0xff] }
  0xae   : > { %v1595_v30 = vand.u32 4294901760, %v1594_v21  ;;  %2404 = vmatpush1.bf16.msra.mxu0 %v2403_v52  ;;  %v2405_v61 = vpack.c.bf16 %v544_v10, %v532_v27  ;;  %v1602_v4 = vand.u32 4294901760, %v1601_v29  ;;  %v555_v48 = vsub.f32 %v4760_v7, %v4555_v25  ;;  %v4765_v29 = vld [vmem:[#allocation59_spill] sm:$0xff] }
  0xaf   : > { %v567_v21 = vsub.f32 %v4761_v24, %v4763_v5  ;;  %v538_v57 = vand.u32 4294901760, %v537_v46  ;;  %v550_v11 = vand.u32 4294901760, %v549_v37  ;;  %v1608_v56 = vsub.f32 %v4762_v26, %v4557_v3  ;;  %v4766_v46 = vld [vmem:[#allocation60_spill] sm:$0xff] }
  0xb0   : > { %v4559_v31 = vand.u32 4294901760, %v4764_v59  ;;  %2406 = vmatprep.subr.bf16.mxu0 %v2405_v61  ;;  %v2677_v52 = vpack.c.bf16 %v1602_v4, %v1595_v30  ;;  %v556_v27 = vand.u32 4294901760, %v555_v48  ;;  %v4558_v28 = vand.u32 4294901760, %v4765_v29  ;;  %v4767_v61 = vld [vmem:[#allocation61_spill] sm:$0xff]  ;;  %v4768_v48 = vld [vmem:[#allocation63_spill] sm:$0xff] }
  0xb1   : > { %v568_v10 = vand.u32 4294901760, %v567_v21  ;;  %v2407_v34 = vpack.c.bf16 %v550_v11, %v538_v57  ;;  %v1609_v25 = vand.u32 4294901760, %v1608_v56  ;;  %v4562_v37 = vand.u32 4294901760, %v4766_v46  ;;  %v4769_v56 = vld [vmem:[#allocation65_spill] sm:$0xff] }
  0xb2   : > { %v1615_v5 = vsub.f32 %v4764_v59, %v4559_v31  ;;  %2678 = vmatpush1.bf16.msra.mxu1 %v2677_v52  ;;  %v561_v3 = vsub.f32 %v4765_v29, %v4558_v28  ;;  %v4564_v4 = vand.u32 4294901760, %v4767_v61  ;;  %v4566_v30 = vand.u32 4294901760, %v4768_v48  ;;  %v4770_v52 = vld [vmem:[#allocation66_spill] sm:$0xff]  ;;  %v4771_v31 = vld [vmem:[#allocation68_spill] sm:$0xff] }
  0xb3   : > { %v2409_v24 = vpack.c.bf16 %v568_v10, %v556_v27  ;;  %2408 = vmatpush1.bf16.msra.mxu0 %v2407_v34  ;;  %2679 = vmatprep.subr.bf16.mxu1 %v4694_v38  ;;  %v573_v57 = vsub.f32 %v4766_v46, %v4562_v37  ;;  %v4569_v21 = vand.u32 4294901760, %v4769_v56  ;;  %v4571_v27 = vand.u32 4294901760, %v4770_v52 }
  0xb4   : > { %v1616_v11 = vand.u32 4294901760, %v1615_v5  ;;  %v562_v10 = vand.u32 4294901760, %v561_v3  ;;  %v579_v28 = vsub.f32 %v4767_v61, %v4564_v4  ;;  %v591_v34 = vsub.f32 %v4768_v48, %v4566_v30  ;;  %v4772_v61 = vld [vmem:[#allocation69_spill] sm:$0xff] }
  0xb5   : > { %2410 = vmatprep.subr.bf16.mxu0 %v2409_v24  ;;  %v4572_v5 = vand.u32 4294901760, %v4771_v31  ;;  %v574_v59 = vand.u32 4294901760, %v573_v57  ;;  %v1622_v37 = vsub.f32 %v4769_v56, %v4569_v21  ;;  %v1629_v24 = vsub.f32 %v4770_v52, %v4571_v27  ;;  %v4773_v57 = vld [vmem:[#allocation71_spill] sm:$0xff] }
  0xb6   : > { %v2680_v29 = vpack.c.bf16 %v1616_v11, %v1609_v25  ;;  %v580_v3 = vand.u32 4294901760, %v579_v28  ;;  %v592_v46 = vand.u32 4294901760, %v591_v34  ;;  %v4576_v30 = vand.u32 4294901760, %v4772_v61  ;;  %v4774_v34 = vld [vmem:[#allocation72_spill] sm:$0xff] }
  0xb7   : > { %v585_v4 = vsub.f32 %v4771_v31, %v4572_v5  ;;  %v2411_v48 = vpack.c.bf16 %v574_v59, %v562_v10  ;;  %v1623_v25 = vand.u32 4294901760, %v1622_v37  ;;  %v1630_v11 = vand.u32 4294901760, %v1629_v24  ;;  %v4776_v10 = vld [vmem:[#allocation75_spill] sm:$0xff] }
  0xb8   : > { %2681 = vmatpush1.bf16.msra.mxu1 %v2680_v29  ;;  %v4574_v26 = vand.u32 4294901760, %v4773_v57  ;;  %v2413_v21 = vpack.c.bf16 %v592_v46, %v580_v3  ;;  %v597_v28 = vsub.f32 %v4772_v61, %v4576_v30  ;;  %v4575_v27 = vand.u32 4294901760, %v4774_v34  ;;  %v4775_v29 = vld [vmem:[#allocation73_spill] sm:$0xff] }
  0xb9   : > { %2682 = vmatprep.subr.bf16.mxu1 %v4694_v38  ;;  %v586_v56 = vand.u32 4294901760, %v585_v4  ;;  %2412 = vmatpush1.bf16.msra.mxu0 %v2411_v48  ;;  %v2683_v5 = vpack.c.bf16 %v1630_v11, %v1623_v25  ;;  %v4577_v37 = vand.u32 4294901760, %v4775_v29  ;;  %v4578_v24 = vand.u32 4294901760, %v4776_v10 }
  0xba   : > { %v603_v59 = vsub.f32 %v4773_v57, %v4574_v26  ;;  %2414 = vmatprep.subr.bf16.mxu0 %v2413_v21  ;;  %v598_v31 = vand.u32 4294901760, %v597_v28  ;;  %v615_v46 = vsub.f32 %v4774_v34, %v4575_v27  ;;  %v4584_v4 = vand.u32 4294901760, %v3447_v13  ;;  %v4777_v21 = vld [vmem:[#allocation79_spill] sm:$0xff]  ;;  %v4779_v34 = vld [vmem:[#allocation82_spill] sm:$0xff] }
  0xbb   : > { %v4585_v3 = vand.u32 4294901760, %v3449_v20  ;;  %v1636_v25 = vsub.f32 %v4775_v29, %v4577_v37  ;;  %v1643_v11 = vsub.f32 %v4776_v10, %v4578_v24  ;;  %v4588_v28 = vand.u32 4294901760, %v4777_v21  ;;  %v4778_v10 = vld [vmem:[#allocation80_spill] sm:$0xff] }
  0xbc   : > { %2684 = vmatpush1.bf16.msra.mxu1 %v2683_v5  ;;  %v604_v48 = vand.u32 4294901760, %v603_v59  ;;  %v2415_v26 = vpack.c.bf16 %v598_v31, %v586_v56  ;;  %v616_v27 = vand.u32 4294901760, %v615_v46  ;;  %v609_v30 = vsub.f32 %v3447_v13, %v4584_v4 }
  0xbd   : > { %2685 = vmatprep.subr.bf16.mxu1 %v4694_v38  ;;  %v621_v5 = vsub.f32 %v3449_v20, %v4585_v3  ;;  %v1637_v59 = vand.u32 4294901760, %v1636_v25  ;;  %v1644_v37 = vand.u32 4294901760, %v1643_v11  ;;  %v627_v24 = vsub.f32 %v4777_v21, %v4588_v28  ;;  %v4780_v25 = vld [vmem:[#allocation83_spill] sm:$0xff] }
  0xbe   : > { %v4593_v29 = vand.u32 4294901760, %v4778_v10  ;;  %2416 = vmatpush1.bf16.msra.mxu0 %v2415_v26  ;;  %v2417_v31 = vpack.c.bf16 %v616_v27, %v604_v48  ;;  %v610_v56 = vand.u32 4294901760, %v609_v30  ;;  %v4590_v57 = vand.u32 4294901760, %v4779_v34  ;;  %v4781_v26 = vld [vmem:[#allocation84_spill] sm:$0xff] }
  0xbf   : > { %v622_v46 = vand.u32 4294901760, %v621_v5  ;;  %v2686_v61 = vpack.c.bf16 %v1644_v37, %v1637_v59  ;;  %v628_v4 = vand.u32 4294901760, %v627_v24  ;;  %v4589_v11 = vand.u32 4294901760, %v4780_v25 }
  0xc0   : > { %v639_v3 = vsub.f32 %v4778_v10, %v4593_v29  ;;  %2418 = vmatprep.subr.bf16.mxu0 %v2417_v31  ;;  %v1650_v28 = vsub.f32 %v4779_v34, %v4590_v57  ;;  %v4591_v27 = vand.u32 4294901760, %v4781_v26  ;;  %v4592_v30 = vand.u32 4294901760, %v3471_v16  ;;  %v183_v29 = vld [vmem:[%s3245_s3 + $0x18] sm:$0xff] }
  0xc1   : > { %v2419_v20 = vpack.c.bf16 %v622_v46, %v610_v56  ;;  %2687 = vmatpush1.bf16.msra.mxu1 %v2686_v61  ;;  %v1657_v37 = vsub.f32 %v4780_v25, %v4589_v11  ;;  %v4596_v24 = vand.u32 4294901760, %v3475_v0  ;;  %v4600_v5 = vand.u32 4294901760, %v3477_v33 }
  0xc2   : > { %v640_v48 = vand.u32 4294901760, %v639_v3  ;;  %2688 = vmatprep.subr.bf16.mxu1 %v4694_v38  ;;  %v1651_v59 = vand.u32 4294901760, %v1650_v28  ;;  %v633_v31 = vsub.f32 %v4781_v26, %v4591_v27  ;;  %v645_v61 = vsub.f32 %v3471_v16, %v4592_v30  ;;  %v4782_v16 = vld [vmem:[#allocation92_spill] sm:$0xff] }
  0xc3   : > { %2420 = vmatpush1.bf16.msra.mxu0 %v2419_v20  ;;  %v4603_v3 = vand.u32 4294901760, %v3481_v32  ;;  %v1658_v46 = vand.u32 4294901760, %v1657_v37  ;;  %v651_v11 = vsub.f32 %v3475_v0, %v4596_v24  ;;  %v663_v20 = vsub.f32 %v3477_v33, %v4600_v5  ;;  %v182_v33 = vld [vmem:[%s3245_s3 + $0x10] sm:$0xff] }
  0xc4   : > { %v2421_v56 = vpack.c.bf16 %v640_v48, %v628_v4  ;;  %v634_v28 = vand.u32 4294901760, %v633_v31  ;;  %v646_v57 = vand.u32 4294901760, %v645_v61  ;;  %v4609_v30 = vand.u32 4294901760, %v3483_v43  ;;  %v4783_v61 = vld [vmem:[#allocation93_spill] sm:$0xff] }
  0xc5   : > { %v1664_v27 = vsub.f32 %v3481_v32, %v4603_v3  ;;  %v2689_v4 = vpack.c.bf16 %v1658_v46, %v1651_v59  ;;  %v652_v48 = vand.u32 4294901760, %v651_v11  ;;  %v664_v37 = vand.u32 4294901760, %v663_v20 }
  0xc6   : > { %2422 = vmatprep.subr.bf16.mxu0 %v2421_v56  ;;  %v4605_v24 = vand.u32 4294901760, %v4782_v16  ;;  %v2423_v0 = vpack.c.bf16 %v646_v57, %v634_v28  ;;  %v1671_v31 = vsub.f32 %v3483_v43, %v4609_v30  ;;  %v4604_v5 = vand.u32 4294901760, %v4783_v61 }
  0xc7   : > { %v1665_v26 = vand.u32 4294901760, %v1664_v27  ;;  %2690 = vmatpush1.bf16.msra.mxu1 %v2689_v4  ;;  %v2425_v3 = vpack.c.bf16 %v664_v37, %v652_v48  ;;  %v261_v11 = vsel %vm256_vm0, %v183_v29, 0  ;;  %v4606_v59 = vand.u32 4294901760, %v3496_v23 }
  0xc8   : > { %v657_v56 = vsub.f32 %v4782_v16, %v4605_v24  ;;  %2424 = vmatpush1.bf16.msra.mxu0 %v2423_v0  ;;  %2691 = vmatprep.subr.bf16.mxu1 %v4694_v38  ;;  %v1672_v57 = vand.u32 4294901760, %v1671_v31  ;;  %v669_v27 = vsub.f32 %v4783_v61, %v4604_v5  ;;  %v3821_v46 = vand.u32 4294901760, %v261_v11 }
  0xc9   : > { %v4608_v20 = vand.u32 4294901760, %v3503_v55  ;;  %2426 = vmatprep.subr.bf16.mxu0 %v2425_v3  ;;  %v675_v29 = vsub.f32 %v3496_v23, %v4606_v59  ;;  %v3827_v4 = vand.u32 4294901760, %v182_v33  ;;  %v4607_v0 = vand.u32 4294901760, %v3507_v9 }
  0xca   : > { %4784 = vst [vmem:[#allocation53_spill] sm:$0xff] %v3821_v46  ;;  %v658_v28 = vand.u32 4294901760, %v657_v56  ;;  %v2692_v48 = vpack.c.bf16 %v1672_v57, %v1665_v26  ;;  %v670_v37 = vand.u32 4294901760, %v669_v27  ;;  %v3831_v31 = vsub.f32 %v261_v11, %v3821_v46 }
  0xcb   : > { %4785 = vst [vmem:[#allocation66_spill] sm:$0xff] %v3827_v4  ;;  %v687_v5 = vsub.f32 %v3503_v55, %v4608_v20  ;;  %v676_v24 = vand.u32 4294901760, %v675_v29  ;;  %v3837_v3 = vsub.f32 %v182_v33, %v3827_v4  ;;  %v1678_v56 = vsub.f32 %v3507_v9, %v4607_v0 }
  0xcc   : > { %4786 = vst [vmem:[#allocation79_spill] sm:$0xff] %v3831_v31  ;;  %v4610_v59 = vand.u32 4294901760, %v3510_v44  ;;  %2693 = vmatpush1.bf16.msra.mxu1 %v2692_v48  ;;  %v2427_v26 = vpack.c.bf16 %v670_v37, %v658_v28  ;;  %v3844_v57 = vand.u32 4294901760, %v3831_v31  ;;  %v4617_v27 = vand.u32 4294901760, %v3514_v39 }
  0xcd   : > { %4787 = vst [vmem:[#allocation80_spill] sm:$0xff] %v3837_v3  ;;  %v688_v11 = vand.u32 4294901760, %v687_v5  ;;  %2694 = vmatprep.subr.bf16.mxu1 %v4694_v38  ;;  %v3849_v29 = vand.u32 4294901760, %v3837_v3  ;;  %v1679_v33 = vand.u32 4294901760, %v1678_v56  ;;  %v4624_v20 = vand.u32 4294901760, %v3516_v1 }
  0xce   : > { %4788 = vst [vmem:[#allocation82_spill] sm:$0xff] %v3844_v57  ;;  %v1685_v0 = vsub.f32 %v3510_v44, %v4610_v59  ;;  %2428 = vmatpush1.bf16.msra.mxu0 %v2427_v26  ;;  %v394_v28 = vsub.f32 %v3831_v31, %v3844_v57  ;;  %v681_v5 = vsub.f32 %v3514_v39, %v4617_v27  ;;  %v4790_v26 = vld [vmem:[#allocation16_spill] sm:$0xff]  ;;  %v4792_v31 = vld [vmem:[#allocation19_spill] sm:$0xff] }
  0xcf   : > { %4789 = vst [vmem:[#allocation83_spill] sm:$0xff] %v3849_v29  ;;  %v2429_v48 = vpack.c.bf16 %v688_v11, %v676_v24  ;;  %v2433_v37 = vpack.c.bf16 %v3260_v18, %v3258_v17  ;;  %v400_v56 = vsub.f32 %v3837_v3, %v3849_v29  ;;  %v693_v59 = vsub.f32 %v3516_v1, %v4624_v20  ;;  %v4791_v11 = vld [vmem:[#allocation18_spill] sm:$0xff]  ;;  %v4805_v3 = vld [vmem:[#allocation65_spill] sm:$0xff] }
  0xd0   : > { %v1686_v30 = vand.u32 4294901760, %v1685_v0  ;;  %v2698_v44 = vpack.c.bf16 %v4790_v26, %v3262_v19  ;;  %v395_v57 = vand.u32 4294901760, %v394_v28  ;;  %v682_v24 = vand.u32 4294901760, %v681_v5  ;;  %v4804_v26 = vld [vmem:[#allocation57_spill] sm:$0xff] }
  0xd1   : > { %2430 = vmatprep.subr.bf16.mxu0 %v2429_v48  ;;  %v2435_v27 = vpack.c.bf16 %v4792_v31, %v4791_v11  ;;  %v2437_v18 = vpack.c.bf16 %v3282_v41, %v3280_v40  ;;  %v401_v17 = vand.u32 4294901760, %v400_v56  ;;  %v694_v29 = vand.u32 4294901760, %v693_v59  ;;  %v4801_v41 = vld [vmem:[#allocation54_spill] sm:$0xff]  ;;  %v4802_v31 = vld [vmem:[#allocation101_spill] sm:$0xff]  ;;  %v4803_v11 = vld [vmem:[#allocation56_spill] sm:$0xff] }
  0xd2   : > { %v2695_v39 = vpack.c.bf16 %v1686_v30, %v1679_v33  ;;  %v2701_v0 = vpack.c.bf16 %v3288_v47, %v3284_v42  ;;  %1509 = vmatprep.mubr.f32.mxu1 %v395_v57  ;;  %396 = vmatprep.mubr.f32.mxu0 %v395_v57  ;;  %v2439_v20 = vpack.c.bf16 %v3295_v51, %v3292_v49  ;;  %v4793_v57 = vld [vmem:[#allocation100_spill] sm:$0xff]  ;;  %v4799_v47 = vld [vmem:[#allocation49_spill] sm:$0xff]  ;;  %v4800_v42 = vld [vmem:[#allocation51_spill] sm:$0xff]  ;;  %v4810_v1 = vand.u32 4294901760, %v3323_v15 }
  0xd3   : > { %v2441_v28 = vpack.c.bf16 %v3304_v62, %v3297_v53  ;;  %v2704_v48 = vpack.c.bf16 %v3310_v6, %v3306_v63  ;;  %1515 = vmatmul.mubr.f32.gmra.mrb[2].mxu1 %v401_v17  ;;  %402 = vmatmul.mubr.f32.gmra.mrb[2].mxu0 %v401_v17  ;;  %v2431_v5 = vpack.c.bf16 %v694_v29, %v682_v24  ;;  %v4794_v29 = vld [vmem:[#allocation42_spill] sm:$0xff]  ;;  %v4795_v24 = vld [vmem:[#allocation44_spill] sm:$0xff]  ;;  %v4796_v63 = vld [vmem:[#allocation45_spill] sm:$0xff]  ;;  %v4812_v19 = vand.u32 4294901760, %v3333_v36 }
  0xd4   : > { %v2443_v30 = vpack.c.bf16 %v3317_v12, %v3314_v8  ;;  %v2445_v59 = vpack.c.bf16 %v3323_v15, %v3321_v14  ;;  %2696 = vmatpush1.bf16.msra.mxu1 %v2695_v39  ;;  %1705 = vmatprep.mubr.f32.mxu1 %v4793_v57  ;;  %v2707_v33 = vpack.c.bf16 %v3333_v36, %v3331_v35  ;;  %v4797_v53 = vld [vmem:[#allocation47_spill] sm:$0xff]  ;;  %v4798_v51 = vld [vmem:[#allocation48_spill] sm:$0xff] }
  0xd5   : > { %v2447_v56 = vpack.c.bf16 %v3339_v50, %v3337_v45  ;;  %v2449_v6 = vpack.c.bf16 %v3347_v58, %v3343_v54  ;;  %2432 = vmatpush1.bf16.msra.mxu0 %v2431_v5  ;;  %2697 = vmatprep.subr.bf16.mxu1 %v4694_v38  ;;  %v2710_v17 = vpack.c.bf16 %v3355_v2, %v3351_v60 }
  0xd6   : > { %v2451_v39 = vpack.c.bf16 %v4794_v29, %v3357_v22  ;;  %v2453_v62 = vpack.c.bf16 %v4796_v63, %v4795_v24  ;;  %713 = vmatprep.mubr.f32.mxu0 %v4793_v57  ;;  %2434 = vmatprep.subr.bf16.mxu0 %v2433_v37  ;;  %v2713_v49 = vpack.c.bf16 %v4798_v51, %v4797_v53 }
  0xd7   : > { %v2455_v5 = vpack.c.bf16 %v4800_v42, %v4799_v47  ;;  %1707 = vmatmul.mubr.f32.vlgmr.msra.gmra.mrb[0].mxu1 %v4802_v31 }
  0xd8   : > { %2699 = vmatpush1.bf16.msra.mxu1 %v2698_v44  ;;  %715 = vmatmul.mubr.f32.vlgmr.msra.gmra.mrb[0].mxu0 %v4802_v31  ;;  %v4806_v44 = vand.u32 4294901760, %v3314_v8  ;;  %v4813_v8 = vand.u32 4294901760, %v3337_v45  ;;  %v4820_v45 = vand.u32 4294901760, %v4794_v29  ;;  %v4827_v29 = vand.u32 4294901760, %v4800_v42 }
  0xd9   : > { %2436 = vmatpush1.bf16.msra.mxu0 %v2435_v27  ;;  %2700 = vmatprep.subr.bf16.mxu1 %v4694_v38  ;;  %v4807_v27 = vand.u32 4294901760, %v3317_v12  ;;  %v4814_v12 = vand.u32 4294901760, %v3339_v50 }
  0xda   : > { %2438 = vmatprep.subr.bf16.mxu0 %v2437_v18  ;;  %1712 = vmatprep.mubr.f32.mxu1 %v3821_v46  ;;  %v4808_v18 = vld [vmem:[#allocation102_spill] sm:$0xff] }
  0xdb   : > { %721 = vmatprep.mubr.f32.mxu0 %v3821_v46  ;;  %1714 = vmatmul.mubr.f32.gmra.mrb[2].mxu1 %v3827_v4  ;;  %v3922_v37 = vpack.c.bf16 %v4807_v27, %v4806_v44  ;;  %v3942_v44 = vpack.c.bf16 %v4814_v12, %v4813_v8  ;;  %v4815_v27 = vand.u32 4294901760, %v3343_v54  ;;  %v4822_v54 = vand.u32 4294901760, %v4796_v63  ;;  %v4835_v8 = vld [vmem:[#allocation59_spill] sm:$0xff] }
  0xdc   : > { %2702 = vmatpush1.bf16.msra.mxu1 %v2701_v0  ;;  %723 = vmatmul.mubr.f32.gmra.mrb[2].mxu0 %v3827_v4  ;;  %v4809_v0 = vand.u32 4294901760, %v3321_v14  ;;  %v4816_v14 = vand.u32 4294901760, %v3347_v58  ;;  %v4823_v58 = vand.u32 4294901760, %v4797_v53  ;;  %v4830_v63 = vand.u32 4294901760, %v4801_v41  ;;  %v4860_v4 = vld [vmem:[#allocation75_spill] sm:$0xff] }
  0xdd   : > { %2440 = vmatpush1.bf16.msra.mxu0 %v2439_v20  ;;  %2703 = vmatprep.subr.bf16.mxu1 %v4694_v38  ;;  %v4833_v53 = vand.u32 4294901760, %v4804_v26  ;;  %v4836_v12 = vand.u32 4294901760, %v4835_v8  ;;  %v4861_v46 = vand.u32 4294901760, %v4860_v4 }
  0xde   : > { %2442 = vmatprep.subr.bf16.mxu0 %v2441_v28  ;;  %1833 = vmatprep.mubr.f32.mxu1 %v4808_v18  ;;  %v3930_v20 = vpack.c.bf16 %v4810_v1, %v4809_v0  ;;  %v4811_v28 = vand.u32 4294901760, %v3331_v35  ;;  %v3948_v15 = vpack.c.bf16 %v4816_v14, %v4815_v27  ;;  %v4817_v1 = vand.u32 4294901760, %v3351_v60  ;;  %v4840_v14 = vld [vmem:[#allocation61_spill] sm:$0xff] }
  0xdf   : > { %891 = vmatprep.mubr.f32.mxu0 %v4808_v18  ;;  %v4818_v35 = vand.u32 4294901760, %v3355_v2  ;;  %v4824_v60 = vand.u32 4294901760, %v4798_v51 }
  0xe0   : > { %v3936_v40 = vpack.c.bf16 %v4812_v19, %v4811_v28  ;;  %2705 = vmatpush1.bf16.msra.mxu1 %v2704_v48  ;;  %v4819_v19 = vand.u32 4294901760, %v3357_v22  ;;  %v4821_v48 = vand.u32 4294901760, %v4795_v24  ;;  %v4826_v22 = vand.u32 4294901760, %v4799_v47  ;;  %v4837_v47 = vld [vmem:[#allocation60_spill] sm:$0xff] }
  0xe1   : > { %v3954_v36 = vpack.c.bf16 %v4818_v35, %v4817_v1  ;;  %2444 = vmatpush1.bf16.msra.mxu0 %v2443_v30  ;;  %2706 = vmatprep.subr.bf16.mxu1 %v4694_v38  ;;  %v3973_v2 = vpack.c.bf16 %v4824_v60, %v4823_v58  ;;  %v4829_v24 = vand.u32 4294901760, %v4760_v7  ;;  %v4832_v30 = vand.u32 4294901760, %v4803_v11  ;;  %v4842_v35 = vld [vmem:[#allocation63_spill] sm:$0xff]  ;;  %v4848_v58 = vld [vmem:[#allocation68_spill] sm:$0xff] }
  0xe2   : > { %v3960_v50 = vpack.c.bf16 %v4820_v45, %v4819_v19  ;;  %v3966_v18 = vpack.c.bf16 %v4822_v54, %v4821_v48  ;;  %v3979_v0 = vpack.c.bf16 %v4827_v29, %v4826_v22  ;;  %2446 = vmatprep.subr.bf16.mxu0 %v2445_v59  ;;  %v4838_v27 = vand.u32 4294901760, %v4837_v47  ;;  %v4850_v22 = vld [vmem:[#allocation69_spill] sm:$0xff] }
  0xe3   : > { %4825 = vst [vmem:[#allocation92_spill] sm:$0xff] %v3973_v2  ;;  %v3985_v28 = vpack.c.bf16 %v4830_v63, %v4829_v24  ;;  %v3991_v51 = vpack.c.bf16 %v4833_v53, %v4832_v30  ;;  %v4841_v1 = vand.u32 4294901760, %v4840_v14  ;;  %v4843_v19 = vand.u32 4294901760, %v4842_v35  ;;  %v4853_v63 = vld [vmem:[#allocation71_spill] sm:$0xff]  ;;  %v4855_v53 = vld [vmem:[#allocation72_spill] sm:$0xff] }
  0xe4   : > { %4828 = vst [vmem:[#allocation93_spill] sm:$0xff] %v3979_v0  ;;  %v3997_v42 = vpack.c.bf16 %v4838_v27, %v4836_v12  ;;  %v4845_v59 = vand.u32 4294901760, %v4805_v3  ;;  %v4846_v48 = vand.u32 4294901760, %v4770_v52  ;;  %v4849_v60 = vand.u32 4294901760, %v4848_v58  ;;  %2708 = vmatpush1.bf16.msra.mxu1 %v2707_v33 }
  0xe5   : > { %4831 = vst [vmem:[#allocation100_spill] sm:$0xff] %v3985_v28  ;;  %4834 = vst [vmem:[#allocation42_spill] sm:$0xff] %v3991_v51  ;;  %v4003_v45 = vpack.c.bf16 %v4843_v19, %v4841_v1  ;;  %v4851_v29 = vand.u32 4294901760, %v4850_v22  ;;  %v4854_v30 = vand.u32 4294901760, %v4853_v63  ;;  %v4856_v12 = vand.u32 4294901760, %v4855_v53  ;;  %v4858_v1 = vld [vmem:[#allocation73_spill] sm:$0xff]  ;;  %2448 = vmatpush1.bf16.msra.mxu0 %v2447_v56  ;;  %2709 = vmatprep.subr.bf16.mxu1 %v4694_v38 }
  0xe6   : > { %4839 = vst [vmem:[#allocation44_spill] sm:$0xff] %v3997_v42  ;;  %v4009_v54 = vpack.c.bf16 %v4846_v48, %v4845_v59  ;;  %v4859_v19 = vand.u32 4294901760, %v4858_v1  ;;  %v4863_v59 = vand.u32 4294901760, %v3447_v13  ;;  %v4864_v48 = vld [vmem:[#allocation77_spill] sm:$0xff]  ;;  %2450 = vmatprep.subr.bf16.mxu0 %v2449_v6  ;;  %v4890_v56 = vand.u32 4294901760, %v3507_v9 }
  0xe7   : > { %4844 = vst [vmem:[#allocation45_spill] sm:$0xff] %v4003_v45  ;;  %v4015_v24 = vpack.c.bf16 %v4851_v29, %v4849_v60  ;;  %v4021_v27 = vpack.c.bf16 %v4856_v12, %v4854_v30  ;;  %v4867_v60 = vand.u32 4294901760, %v4777_v21  ;;  %v4868_v29 = vand.u32 4294901760, %v4778_v10 }
  0xe8   : > { %4847 = vst [vmem:[#allocation47_spill] sm:$0xff] %v4009_v54  ;;  %v4027_v31 = vpack.c.bf16 %v4861_v46, %v4859_v19  ;;  %v4865_v54 = vand.u32 4294901760, %v4864_v48  ;;  %v4870_v30 = vand.u32 4294901760, %v4779_v34  ;;  %v4871_v12 = vand.u32 4294901760, %v4780_v25  ;;  %v4873_v46 = vld [vmem:[#allocation84_spill] sm:$0xff]  ;;  %2711 = vmatpush1.bf16.msra.mxu1 %v2710_v17 }
  0xe9   : > { %4852 = vst [vmem:[#allocation48_spill] sm:$0xff] %v4015_v24  ;;  %4857 = vst [vmem:[#allocation49_spill] sm:$0xff] %v4021_v27  ;;  %v4039_v24 = vpack.c.bf16 %v4868_v29, %v4867_v60  ;;  %v4874_v19 = vand.u32 4294901760, %v4873_v46  ;;  %v4883_v60 = vand.u32 4294901760, %v3481_v32  ;;  %v4884_v29 = vand.u32 4294901760, %v3483_v43  ;;  %2452 = vmatpush1.bf16.msra.mxu0 %v2451_v39  ;;  %2712 = vmatprep.subr.bf16.mxu1 %v4694_v38 }
  0xea   : > { %4862 = vst [vmem:[#allocation51_spill] sm:$0xff] %v4027_v31  ;;  %v4033_v45 = vpack.c.bf16 %v4865_v54, %v4863_v59  ;;  %v4045_v27 = vpack.c.bf16 %v4871_v12, %v4870_v30  ;;  %v4875_v31 = vld [vmem:[#allocation86_spill] sm:$0xff]  ;;  %v4878_v54 = vld [vmem:[#allocation88_spill] sm:$0xff]  ;;  %v4880_v59 = vld [vmem:[#allocation89_spill] sm:$0xff]  ;;  %v4886_v12 = vand.u32 4294901760, %v4782_v16  ;;  %2454 = vmatprep.subr.bf16.mxu0 %v2453_v62  ;;  %v2459_v6 = vpack.c.bf16 %v4837_v47, %v4835_v8 }
  0xeb   : > { %4869 = vst [vmem:[#allocation56_spill] sm:$0xff] %v4039_v24  ;;  %v4876_v42 = vand.u32 4294901760, %v4875_v31  ;;  %v4879_v33 = vand.u32 4294901760, %v4878_v54  ;;  %v4064_v30 = vpack.c.bf16 %v4884_v29, %v4883_v60  ;;  %v4893_v60 = vld [vmem:[#allocation98_spill] sm:$0xff]  ;;  %v4898_v17 = vpack.c.bf16 %v4804_v26, %v4803_v11  ;;  %v4911_v8 = vld [vmem:[#allocation33_spill] sm:$0xff]  ;;  %v4912_v47 = vld [vmem:[#allocation35_spill] sm:$0xff] }
  0xec   : > { %4866 = vst [vmem:[#allocation54_spill] sm:$0xff] %v4033_v45  ;;  %4872 = vst [vmem:[#allocation57_spill] sm:$0xff] %v4045_v27  ;;  %v4881_v45 = vand.u32 4294901760, %v4880_v59  ;;  %v4894_v29 = vand.u32 4294901760, %v4893_v60  ;;  %2714 = vmatpush1.bf16.msra.mxu1 %v2713_v49  ;;  %v2463_v49 = vpack.c.bf16 %v4850_v22, %v4848_v58  ;;  %v2465_v62 = vpack.c.bf16 %v4855_v53, %v4853_v63  ;;  %v4915_v58 = vld [vmem:[#allocation38_spill] sm:$0xff]  ;;  %v4916_v22 = vld [vmem:[#allocation39_spill] sm:$0xff] }
  0xed   : > { %v4051_v51 = vpack.c.bf16 %v4876_v42, %v4874_v19  ;;  %4885 = vst [vmem:[#allocation59_spill] sm:$0xff] %v4064_v30  ;;  %v4887_v42 = vand.u32 4294901760, %v4783_v61  ;;  %v4895_v30 = vld [vmem:[#allocation99_spill] sm:$0xff]  ;;  %2456 = vmatpush1.bf16.msra.mxu0 %v2455_v5  ;;  %2715 = vmatprep.subr.bf16.mxu1 %v4694_v38  ;;  %v2467_v26 = vpack.c.bf16 %v4864_v48, %v3447_v13  ;;  %v4909_v5 = vld [vmem:[#allocation30_spill] sm:$0xff]  ;;  %v4917_v63 = vld [vmem:[#allocation40_spill] sm:$0xff] }
  0xee   : > { %v4057_v28 = vpack.c.bf16 %v4881_v45, %v4879_v33  ;;  %v4889_v45 = vand.u32 4294901760, %v3503_v55  ;;  %v4896_v0 = vand.u32 4294901760, %v4895_v30  ;;  %v2469_v11 = vpack.c.bf16 %v4778_v10, %v4777_v21  ;;  %v4918_v53 = vld [vmem:[#allocation41_spill] sm:$0xff]  ;;  %v4921_v48 = vld [vmem:[#allocation50_spill] sm:$0xff] }
  0xef   : > { %4877 = vst [vmem:[#allocation65_spill] sm:$0xff] %v4051_v51  ;;  %v4070_v19 = vpack.c.bf16 %v4887_v42, %v4886_v12  ;;  %v4888_v51 = vand.u32 4294901760, %v3496_v23  ;;  %v2725_v39 = vpack.c.bf16 %v4780_v25, %v4779_v34  ;;  %v2728_v13 = vpack.c.bf16 %v3483_v43, %v3481_v32  ;;  %v4900_v32 = vld [vmem:[#allocation11_spill] sm:$0xff]  ;;  %v4926_v12 = vld [vmem:[#allocation64_spill] sm:$0xff] }
  0xf0   : > { %4882 = vst [vmem:[#allocation102_spill] sm:$0xff] %v4057_v28  ;;  %v4891_v28 = vld [vmem:[#allocation96_spill] sm:$0xff]  ;;  %v4088_v2 = vpack.c.bf16 %v4896_v0, %v4894_v29  ;;  %v2461_v0 = vpack.c.bf16 %v4842_v35, %v4840_v14  ;;  %2717 = vmatpush1.bf16.msra.mxu1 %v4898_v17  ;;  %v2475_v34 = vpack.c.bf16 %v4783_v61, %v4782_v16  ;;  %v4901_v16 = vld [vmem:[#allocation103_spill] sm:$0xff]  ;;  %v4914_v35 = vld [vmem:[#allocation37_spill] sm:$0xff] }
  0xf1   : > { %v4076_v33 = vpack.c.bf16 %v4889_v45, %v4888_v51  ;;  %v4892_v27 = vand.u32 4294901760, %v4891_v28  ;;  %v4897_v51 = vpack.c.bf16 %v4801_v41, %v4760_v7  ;;  %2718 = vmatprep.subr.bf16.mxu1 %v4694_v38  ;;  %v4899_v41 = vpack.c.bf16 %v4770_v52, %v4805_v3  ;;  %v4905_v25 = vld [vmem:[#allocation79_spill] sm:$0xff]  ;;  %v4906_v61 = vld [vmem:[#allocation80_spill] sm:$0xff]  ;;  %v4908_v3 = vld [vmem:[#allocation26_spill] sm:$0xff] }
  0xf2   : > { %v2722_v7 = vpack.c.bf16 %v4860_v4, %v4858_v1  ;;  %v2471_v52 = vpack.c.bf16 %v4875_v31, %v4873_v46  ;;  %v2473_v4 = vpack.c.bf16 %v4880_v59, %v4878_v54  ;;  %v2477_v10 = vpack.c.bf16 %v3503_v55, %v3496_v23  ;;  %v4902_v23 = vld [vmem:[#allocation15_spill] sm:$0xff]  ;;  %v4904_v55 = vld [vmem:[#allocation20_spill] sm:$0xff]  ;;  %v4920_v1 = vld [vmem:[#allocation46_spill] sm:$0xff] }
  0xf3   : > { %v4082_v24 = vpack.c.bf16 %v4892_v27, %v4890_v56  ;;  %2458 = vmatprep.subr.bf16.mxu0 %v4897_v51  ;;  %v2731_v21 = vpack.c.bf16 %v4891_v28, %v3507_v9  ;;  %v2479_v43 = vpack.c.bf16 %v4895_v30, %v4893_v60  ;;  %v4903_v9 = vld [vmem:[#allocation17_spill] sm:$0xff]  ;;  %v4907_v31 = vld [vmem:[#allocation24_spill] sm:$0xff]  ;;  %v4919_v27 = vld [vmem:[#allocation43_spill] sm:$0xff] }
  0xf4   : > { %2460 = vmatpush1.bf16.msra.mxu0 %v2459_v6  ;;  %2720 = vmatpush1.bf16.msra.mxu1 %v4899_v41  ;;  %v4910_v28 = vld [vmem:[#allocation104_spill] sm:$0xff]  ;;  %v4923_v54 = vld [vmem:[#allocation55_spill] sm:$0xff]  ;;  %v4924_v59 = vld [vmem:[#allocation58_spill] sm:$0xff] }
  0xf5   : > { %2462 = vmatprep.subr.bf16.mxu0 %v2461_v0  ;;  %2721 = vmatprep.subr.bf16.mxu1 %v4694_v38  ;;  %v4913_v14 = vld [vmem:[#allocation36_spill] sm:$0xff]  ;;  %v4925_v30 = vld [vmem:[#allocation62_spill] sm:$0xff]  ;;  %v4927_v42 = vld [vmem:[#allocation67_spill] sm:$0xff] }
  0xf6   : > { %v4922_v46 = vld [vmem:[#allocation52_spill] sm:$0xff]  ;;  %v4928_v45 = vld [vmem:[#allocation70_spill] sm:$0xff]  ;;  %v4932_v6 = vld [vmem:[#allocation81_spill] sm:$0xff] }
  0xf7   : > { %v4929_v56 = vld [vmem:[#allocation74_spill] sm:$0xff]  ;;  %v4930_v60 = vld [vmem:[#allocation76_spill] sm:$0xff]  ;;  %v4933_v51 = vld [vmem:[#allocation85_spill] sm:$0xff] }
  0xf8   : > { %2464 = vmatpush1.bf16.msra.mxu0 %v2463_v49  ;;  %2723 = vmatpush1.bf16.msra.mxu1 %v2722_v7  ;;  %v4931_v29 = vld [vmem:[#allocation78_spill] sm:$0xff]  ;;  %v4934_v0 = vld [vmem:[#allocation87_spill] sm:$0xff]  ;;  %v4938_v41 = vld [vmem:[#allocation12_spill] sm:$0xff] }
  0xf9   : > { %2466 = vmatprep.subr.bf16.mxu0 %v2465_v62  ;;  %2724 = vmatprep.subr.bf16.mxu1 %v4694_v38  ;;  %v4935_v17 = vld [vmem:[#allocation90_spill] sm:$0xff]  ;;  %v4936_v49 = vld [vmem:[#allocation91_spill] sm:$0xff]  ;;  %v4939_v7 = vand.u32 4294901760, %v4938_v41  ;;  %v4952_v41 = vld [vmem:[#allocation21_spill] sm:$0xff] }
  0xfa   : > { %v4937_v62 = vld [vmem:[#allocation94_spill] sm:$0xff] }
  0xfc   : > { %2468 = vmatpush1.bf16.msra.mxu0 %v2467_v26  ;;  %2726 = vmatpush1.bf16.msra.mxu1 %v2725_v39  ;;  %v4940_v26 = vld [vmem:[#allocation13_spill] sm:$0xff] }
  0xfd   : > { %2470 = vmatprep.subr.bf16.mxu0 %v2469_v11  ;;  %2727 = vmatprep.subr.bf16.mxu1 %v4694_v38  ;;  %v4941_v11 = vand.u32 4294901760, %v4940_v26  ;;  %v4953_v26 = vand.u32 4294901760, %v4952_v41  ;;  %v4965_v41 = vld [vmem:[#allocation29_spill] sm:$0xff] }
  0xff   : > { %v2529_v39 = vpack.c.bf16 %v4941_v11, %v4939_v7  ;;  %v4954_v7 = vld [vmem:[#allocation22_spill] sm:$0xff] }
 0x100   : > { %2472 = vmatpush1.bf16.msra.mxu0 %v2471_v52  ;;  %2729 = vmatpush1.bf16.msra.mxu1 %v2728_v13  ;;  %v4942_v52 = vld [vmem:[#allocation95_spill] sm:$0xff]  ;;  %v4955_v11 = vand.u32 4294901760, %v4954_v7 }
 0x101   : > { %2474 = vmatprep.subr.bf16.mxu0 %v2473_v4  ;;  %2730 = vmatprep.subr.bf16.mxu1 %v4694_v38  ;;  %v4943_v4 = vld [vmem:[#allocation14_spill] sm:$0xff]  ;;  %v4967_v7 = vld [vmem:[#allocation31_spill] sm:$0xff] }
 0x102   : > { %v4944_v13 = vand.u32 4294901760, %v4943_v4  ;;  %v4957_v4 = vld [vmem:[#allocation23_spill] sm:$0xff] }
 0x104   : > { %2476 = vmatpush1.bf16.msra.mxu0 %v2475_v34  ;;  %2732 = vmatpush1.bf16.msra.mxu1 %v2731_v21  ;;  %v4945_v34 = vld [vmem:[#allocation16_spill] sm:$0xff] }
 0x105   : > { %2478 = vmatprep.subr.bf16.mxu0 %v2477_v10  ;;  %2733 = vmatprep.subr.bf16.mxu1 %v4694_v38  ;;  %v4946_v10 = vand.u32 4294901760, %v4945_v34  ;;  %v4959_v34 = vld [vmem:[#allocation25_spill] sm:$0xff] }
 0x107   : > { %1836 = vmatmul.mubr.f32.vlgmr.msra.gmra.mrb[0].mxu1 %v4901_v16  ;;  %v2770_v21 = vpack.c.bf16 %v4946_v10, %v4944_v13  ;;  %v4958_v13 = vand.u32 4294901760, %v4957_v4  ;;  %v4960_v10 = vand.u32 4294901760, %v4959_v34  ;;  %v4970_v4 = vld [vmem:[#allocation83_spill] sm:$0xff]  ;;  %v4973_v34 = vld [vmem:[#allocation34_spill] sm:$0xff] }
 0x108   : > { %2480 = vmatpush1.bf16.msra.mxu0 %v2479_v43  ;;  %2735 = vmatpush1.bf16.msra.mxu1 %v4902_v23  ;;  %v4947_v43 = vld [vmem:[#allocation97_spill] sm:$0xff] }
 0x109   : > { %2482 = vmatprep.subr.bf16.mxu0 %v4900_v32  ;;  %2736 = vmatprep.subr.bf16.mxu1 %v4694_v38 }
 0x10a   : > { %1842 = vmatprep.mubr.f32.mxu1 %v4905_v25 }
 0x10b   : > { %894 = vmatmul.mubr.f32.vlgmr.msra.gmra.mrb[0].mxu0 %v4901_v16  ;;  %1845 = vmatmul.mubr.f32.gmra.mrb[2].mxu1 %v4906_v61  ;;  %v4948_v16 = vld [vmem:[#allocation18_spill] sm:$0xff] }
 0x10c   : > { %2484 = vmatpush1.bf16.msra.mxu0 %v4903_v9  ;;  %901 = vmatprep.mubr.f32.mxu0 %v4905_v25  ;;  %v4949_v25 = vand.u32 4294901760, %v4948_v16  ;;  %v4961_v16 = vld [vmem:[#allocation27_spill] sm:$0xff] }
 0x10d   : > { %2486 = vmatprep.subr.bf16.mxu0 %v4904_v55  ;;  %2738 = vmatpush1.bf16.msra.mxu1 %v4907_v31 }
 0x10e   : > { %2739 = vmatprep.subr.bf16.mxu1 %v4694_v38  ;;  %1941 = vmatprep.mubr.f32.mxu1 %v4910_v28 }
 0x10f   : > { %904 = vmatmul.mubr.f32.gmra.mrb[2].mxu0 %v4906_v61  ;;  %v4950_v61 = vld [vmem:[#allocation19_spill] sm:$0xff] }
 0x110   : > { %2488 = vmatpush1.bf16.msra.mxu0 %v4908_v3  ;;  %1025 = vmatprep.mubr.f32.mxu0 %v4910_v28  ;;  %v4951_v28 = vand.u32 4294901760, %v4950_v61 }
 0x111   : > { %2490 = vmatprep.subr.bf16.mxu0 %v4909_v5  ;;  %2741 = vmatpush1.bf16.msra.mxu1 %v4911_v8 }
 0x112   : > { %2742 = vmatprep.subr.bf16.mxu1 %v4694_v38 }
 0x114   : > { %2492 = vmatpush1.bf16.msra.mxu0 %v4912_v47 }
 0x115   : > { %2494 = vmatprep.subr.bf16.mxu0 %v4913_v14  ;;  %2744 = vmatpush1.bf16.msra.mxu1 %v4914_v35 }
 0x116   : > { %2745 = vmatprep.subr.bf16.mxu1 %v4694_v38 }
 0x118   : > { %2496 = vmatpush1.bf16.msra.mxu0 %v4915_v58 }
 0x119   : > { %2498 = vmatprep.subr.bf16.mxu0 %v4916_v22  ;;  %2747 = vmatpush1.bf16.msra.mxu1 %v4917_v63 }
 0x11a   : > { %2748 = vmatprep.subr.bf16.mxu1 %v4694_v38 }
 0x11c   : > { %2500 = vmatpush1.bf16.msra.mxu0 %v4918_v53 }
 0x11d   : > { %2502 = vmatprep.subr.bf16.mxu0 %v4919_v27  ;;  %2750 = vmatpush1.bf16.msra.mxu1 %v4920_v1 }
 0x11e   : > { %2751 = vmatprep.subr.bf16.mxu1 %v4694_v38 }
 0x120   : > { %2504 = vmatpush1.bf16.msra.mxu0 %v4921_v48 }
 0x121   : > { %2506 = vmatprep.subr.bf16.mxu0 %v4922_v46  ;;  %2753 = vmatpush1.bf16.msra.mxu1 %v4923_v54 }
 0x122   : > { %2754 = vmatprep.subr.bf16.mxu1 %v4694_v38 }
 0x124   : > { %2508 = vmatpush1.bf16.msra.mxu0 %v4924_v59 }
 0x125   : > { %2510 = vmatprep.subr.bf16.mxu0 %v4925_v30  ;;  %2756 = vmatpush1.bf16.msra.mxu1 %v4926_v12 }
 0x126   : > { %2757 = vmatprep.subr.bf16.mxu1 %v4694_v38 }
 0x128   : > { %2512 = vmatpush1.bf16.msra.mxu0 %v4927_v42 }
 0x129   : > { %2514 = vmatprep.subr.bf16.mxu0 %v4928_v45  ;;  %2759 = vmatpush1.bf16.msra.mxu1 %v4929_v56 }
 0x12a   : > { %2760 = vmatprep.subr.bf16.mxu1 %v4694_v38 }
 0x12c   : > { %2516 = vmatpush1.bf16.msra.mxu0 %v4930_v60 }
 0x12d   : > { %2518 = vmatprep.subr.bf16.mxu0 %v4931_v29  ;;  %2762 = vmatpush1.bf16.msra.mxu1 %v4932_v6 }
 0x12e   : > { %2763 = vmatprep.subr.bf16.mxu1 %v4694_v38 }
 0x130   : > { %2520 = vmatpush1.bf16.msra.mxu0 %v4933_v51 }
 0x131   : > { %2522 = vmatprep.subr.bf16.mxu0 %v4934_v0  ;;  %2765 = vmatpush1.bf16.msra.mxu1 %v4935_v17 }
 0x132   : > { %2766 = vmatprep.subr.bf16.mxu1 %v4694_v38 }
 0x134   : > { %2524 = vmatpush1.bf16.msra.mxu0 %v4936_v49  ;;  %v4956_v49 = vld [vmem:[#allocation105_spill] sm:$0xff] }
 0x135   : > { %2526 = vmatprep.subr.bf16.mxu0 %v4937_v62  ;;  %2768 = vmatpush1.bf16.msra.mxu1 %v4942_v52  ;;  %v2531_v62 = vpack.c.bf16 %v4951_v28, %v4949_v25  ;;  %v2533_v52 = vpack.c.bf16 %v4955_v11, %v4953_v26  ;;  %v4963_v25 = vld [vmem:[#allocation28_spill] sm:$0xff]  ;;  %v4966_v26 = vand.u32 4294901760, %v4965_v41  ;;  %v4989_v41 = vld [vmem:[#allocation102_spill] sm:$0xff] }
 0x136   : > { %2769 = vmatprep.subr.bf16.mxu1 %v4694_v38  ;;  %v4964_v61 = vand.u32 4294901760, %v4963_v25  ;;  %v4986_v25 = vld [vmem:[#allocation56_spill] sm:$0xff] }
 0x138   : > { %2528 = vmatpush1.bf16.msra.mxu0 %v4947_v43  ;;  %1945 = vmatmul.mubr.f32.vlgmr.msra.gmra.mrb[0].mxu1 %v4956_v49  ;;  %v2773_v43 = vpack.c.bf16 %v4960_v10, %v4958_v13  ;;  %v4974_v10 = vand.u32 4294901760, %v4973_v34 }
 0x139   : > { %2530 = vmatprep.subr.bf16.mxu0 %v2529_v39  ;;  %2771 = vmatpush1.bf16.msra.mxu1 %v2770_v21  ;;  %v4962_v39 = vand.u32 4294901760, %v4961_v16  ;;  %v4968_v21 = vand.u32 4294901760, %v4967_v7  ;;  %v4991_v7 = vld [vmem:[#allocation101_spill] sm:$0xff] }
 0x13a   : > { %2772 = vmatprep.subr.bf16.mxu1 %v4694_v38 }
 0x13b   : > { %1029 = vmatmul.mubr.f32.vlgmr.msra.gmra.mrb[0].mxu0 %v4956_v49  ;;  %v2535_v28 = vpack.c.bf16 %v4964_v61, %v4962_v39  ;;  %v2537_v11 = vpack.c.bf16 %v4968_v21, %v4966_v26  ;;  %v4969_v49 = vld [vmem:[#allocation82_spill] sm:$0xff]  ;;  %v4987_v61 = vld [vmem:[#allocation57_spill] sm:$0xff]  ;;  %v4990_v26 = vld [vmem:[#allocation59_spill] sm:$0xff] }
 0x13c   : > { %2532 = vmatpush1.bf16.msra.mxu0 %v2531_v62  ;;  %1952 = vmatprep.mubr.f32.mxu1 %v4969_v49  ;;  %v4971_v62 = vld [vmem:[#allocation32_spill] sm:$0xff]  ;;  %v4985_v39 = vld [vmem:[#allocation54_spill] sm:$0xff] }
 0x13d   : > { %2534 = vmatprep.subr.bf16.mxu0 %v2533_v52  ;;  %1037 = vmatprep.mubr.f32.mxu0 %v4969_v49  ;;  %v4972_v13 = vand.u32 4294901760, %v4971_v62  ;;  %v4976_v52 = vld [vmem:[#allocation93_spill] sm:$0xff] }
 0x13e   : > { %1956 = vmatmul.mubr.f32.gmra.mrb[2].mxu1 %v4970_v4 }
 0x13f   : > { %2774 = vmatpush1.bf16.msra.mxu1 %v2773_v43  ;;  %v2776_v16 = vpack.c.bf16 %v4974_v10, %v4972_v13  ;;  %1041 = vmatmul.mubr.f32.gmra.mrb[2].mxu0 %v4970_v4  ;;  %v4984_v43 = vld [vmem:[#allocation51_spill] sm:$0xff] }
 0x140   : > { %2536 = vmatpush1.bf16.msra.mxu0 %v2535_v28  ;;  %2775 = vmatprep.subr.bf16.mxu1 %v4694_v38  ;;  %v4988_v28 = vld [vmem:[#allocation65_spill] sm:$0xff] }
 0x141   : > { %2538 = vmatprep.subr.bf16.mxu0 %v2537_v11  ;;  %2098 = vmatprep.mubr.f32.mxu1 %v4793_v57 }
 0x142   : > { %1256 = vmatprep.mubr.f32.mxu0 %v4793_v57 }
 0x143   : > { %2777 = vmatpush1.bf16.msra.mxu1 %v2776_v16 }
 0x144   : > { %2540 = vmatpush1.bf16.msra.mxu0 %v3922_v37  ;;  %2778 = vmatprep.subr.bf16.mxu1 %v4694_v38  ;;  %v4975_v37 = vld [vmem:[#allocation92_spill] sm:$0xff] }
 0x145   : > { %2542 = vmatprep.subr.bf16.mxu0 %v3930_v20  ;;  %v4978_v20 = vld [vmem:[#allocation42_spill] sm:$0xff] }
 0x147   : > { %2780 = vmatpush1.bf16.msra.mxu1 %v3936_v40  ;;  %v4977_v40 = vld [vmem:[#allocation100_spill] sm:$0xff] }
 0x148   : > { %2544 = vmatpush1.bf16.msra.mxu0 %v3942_v44  ;;  %2781 = vmatprep.subr.bf16.mxu1 %v4694_v38  ;;  %v4979_v44 = vld [vmem:[#allocation44_spill] sm:$0xff] }
 0x149   : > { %2546 = vmatprep.subr.bf16.mxu0 %v3948_v15  ;;  %v4980_v15 = vld [vmem:[#allocation45_spill] sm:$0xff] }
 0x14b   : > { %2783 = vmatpush1.bf16.msra.mxu1 %v3954_v36  ;;  %v4981_v36 = vld [vmem:[#allocation47_spill] sm:$0xff] }
 0x14c   : > { %2548 = vmatpush1.bf16.msra.mxu0 %v3960_v50  ;;  %2784 = vmatprep.subr.bf16.mxu1 %v4694_v38  ;;  %v4982_v50 = vld [vmem:[#allocation48_spill] sm:$0xff] }
 0x14d   : > { %2550 = vmatprep.subr.bf16.mxu0 %v3966_v18  ;;  %v4983_v18 = vld [vmem:[#allocation49_spill] sm:$0xff] }
 0x14f   : > { %2786 = vmatpush1.bf16.msra.mxu1 %v4975_v37 }
 0x150   : > { %2552 = vmatpush1.bf16.msra.mxu0 %v4976_v52  ;;  %2787 = vmatprep.subr.bf16.mxu1 %v4694_v38 }
 0x151   : > { %2554 = vmatprep.subr.bf16.mxu0 %v4977_v40 }
 0x153   : > { %2789 = vmatpush1.bf16.msra.mxu1 %v4978_v20 }
 0x154   : > { %2556 = vmatpush1.bf16.msra.mxu0 %v4979_v44  ;;  %2790 = vmatprep.subr.bf16.mxu1 %v4694_v38 }
 0x155   : > { %2558 = vmatprep.subr.bf16.mxu0 %v4980_v15 }
 0x157   : > { %2792 = vmatpush1.bf16.msra.mxu1 %v4981_v36 }
 0x158   : > { %2560 = vmatpush1.bf16.msra.mxu0 %v4982_v50  ;;  %2793 = vmatprep.subr.bf16.mxu1 %v4694_v38 }
 0x159   : > { %2562 = vmatprep.subr.bf16.mxu0 %v4983_v18 }
 0x15b   : > { %2795 = vmatpush1.bf16.msra.mxu1 %v4984_v43 }
 0x15c   : > { %2564 = vmatpush1.bf16.msra.mxu0 %v4985_v39  ;;  %2796 = vmatprep.subr.bf16.mxu1 %v4694_v38 }
 0x15d   : > { %2566 = vmatprep.subr.bf16.mxu0 %v4986_v25 }
 0x15f   : > { %2798 = vmatpush1.bf16.msra.mxu1 %v4987_v61 }
 0x160   : > { %2568 = vmatpush1.bf16.msra.mxu0 %v4988_v28  ;;  %2799 = vmatprep.subr.bf16.mxu1 %v4694_v38 }
 0x161   : > { %2570 = vmatprep.subr.bf16.mxu0 %v4989_v41 }
 0x163   : > { %2801 = vmatpush1.bf16.msra.mxu1 %v4990_v26 }
 0x164   : > { %2572 = vmatpush1.bf16.msra.mxu0 %v4070_v19  ;;  %2802 = vmatprep.subr.bf16.mxu1 %v4694_v38  ;;  %v4992_v19 = vld [vmem:[#allocation53_spill] sm:$0xff] }
 0x165   : > { %2574 = vmatprep.subr.bf16.mxu0 %v4076_v33  ;;  %v4996_v33 = vld [vmem:[#allocation95_spill] sm:$0xff] }
 0x167   : > { %2804 = vmatpush1.bf16.msra.mxu1 %v4082_v24  ;;  %v4995_v24 = vld [vmem:[#allocation94_spill] sm:$0xff] }
 0x168   : > { %2576 = vmatpush1.bf16.msra.mxu0 %v4088_v2  ;;  %2805 = vmatprep.subr.bf16.mxu1 %v4694_v38  ;;  %v4993_v2 = vld [vmem:[#allocation66_spill] sm:$0xff] }
 0x169   : > { %2578 = vmatprep.subr.bf16.mxu0 %v4900_v32  ;;  %v4997_v32 = vld [vmem:[#allocation97_spill] sm:$0xff] }
 0x16a   : > { %2100 = vmatmul.mubr.f32.vlgmr.msra.gmra.mrb[0].mxu1 %v4991_v7 }
 0x16b   : > { %2807 = vmatpush1.bf16.msra.mxu1 %v4902_v23  ;;  %1258 = vmatmul.mubr.f32.vlgmr.msra.gmra.mrb[0].mxu0 %v4991_v7 }
 0x16c   : > { %2580 = vmatpush1.bf16.msra.mxu0 %v4903_v9  ;;  %2808 = vmatprep.subr.bf16.mxu1 %v4694_v38 }
 0x16d   : > { %2582 = vmatprep.subr.bf16.mxu0 %v4904_v55  ;;  %2105 = vmatprep.mubr.f32.mxu1 %v4992_v19 }
 0x16e   : > { %1264 = vmatprep.mubr.f32.mxu0 %v4992_v19  ;;  %2107 = vmatmul.mubr.f32.gmra.mrb[2].mxu1 %v4993_v2 }
 0x16f   : > { %2810 = vmatpush1.bf16.msra.mxu1 %v4907_v31  ;;  %1266 = vmatmul.mubr.f32.gmra.mrb[2].mxu0 %v4993_v2 }
 0x170   : > { %2584 = vmatpush1.bf16.msra.mxu0 %v4908_v3  ;;  %2811 = vmatprep.subr.bf16.mxu1 %v4694_v38 }
 0x171   : > { %2586 = vmatprep.subr.bf16.mxu0 %v4909_v5  ;;  %2201 = vmatprep.mubr.f32.mxu1 %v4793_v57 }
 0x172   : > { %1385 = vmatprep.mubr.f32.mxu0 %v4793_v57  ;;  %v4994_v57 = vld [vmem:[#allocation91_spill] sm:$0xff] }
 0x173   : > { %2813 = vmatpush1.bf16.msra.mxu1 %v4911_v8 }
 0x174   : > { %2588 = vmatpush1.bf16.msra.mxu0 %v4912_v47  ;;  %2814 = vmatprep.subr.bf16.mxu1 %v4694_v38 }
 0x175   : > { %2590 = vmatprep.subr.bf16.mxu0 %v4913_v14 }
 0x177   : > { %2816 = vmatpush1.bf16.msra.mxu1 %v4914_v35 }
 0x178   : > { %2592 = vmatpush1.bf16.msra.mxu0 %v4915_v58  ;;  %2817 = vmatprep.subr.bf16.mxu1 %v4694_v38 }
 0x179   : > { %2594 = vmatprep.subr.bf16.mxu0 %v4916_v22 }
 0x17b   : > { %2819 = vmatpush1.bf16.msra.mxu1 %v4917_v63 }
 0x17c   : > { %2596 = vmatpush1.bf16.msra.mxu0 %v4918_v53  ;;  %2820 = vmatprep.subr.bf16.mxu1 %v4694_v38 }
 0x17d   : > { %2598 = vmatprep.subr.bf16.mxu0 %v4919_v27 }
 0x17f   : > { %2822 = vmatpush1.bf16.msra.mxu1 %v4920_v1 }
 0x180   : > { %2600 = vmatpush1.bf16.msra.mxu0 %v4921_v48  ;;  %2823 = vmatprep.subr.bf16.mxu1 %v4694_v38 }
 0x181   : > { %2602 = vmatprep.subr.bf16.mxu0 %v4922_v46 }
 0x183   : > { %2825 = vmatpush1.bf16.msra.mxu1 %v4923_v54 }
 0x184   : > { %2604 = vmatpush1.bf16.msra.mxu0 %v4924_v59  ;;  %2826 = vmatprep.subr.bf16.mxu1 %v4694_v38 }
 0x185   : > { %2606 = vmatprep.subr.bf16.mxu0 %v4925_v30 }
 0x187   : > { %2828 = vmatpush1.bf16.msra.mxu1 %v4926_v12 }
 0x188   : > { %2608 = vmatpush1.bf16.msra.mxu0 %v4927_v42  ;;  %2829 = vmatprep.subr.bf16.mxu1 %v4694_v38 }
 0x189   : > { %2610 = vmatprep.subr.bf16.mxu0 %v4928_v45 }
 0x18b   : > { %2831 = vmatpush1.bf16.msra.mxu1 %v4929_v56 }
 0x18c   : > { %2612 = vmatpush1.bf16.msra.mxu0 %v4930_v60  ;;  %2832 = vmatprep.subr.bf16.mxu1 %v4694_v38 }
 0x18d   : > { %2614 = vmatprep.subr.bf16.mxu0 %v4931_v29 }
 0x18f   : > { %2834 = vmatpush1.bf16.msra.mxu1 %v4932_v6 }
 0x190   : > { %2616 = vmatpush1.bf16.msra.mxu0 %v4933_v51  ;;  %2835 = vmatprep.subr.bf16.mxu1 %v4694_v38 }
 0x191   : > { %2618 = vmatprep.subr.bf16.mxu0 %v4934_v0 }
 0x193   : > { %2837 = vmatpush1.bf16.msra.mxu1 %v4935_v17 }
 0x194   : > { %2620 = vmatpush1.bf16.msra.mxu0 %v4994_v57  ;;  %2838 = vmatprep.subr.bf16.mxu1 %v4694_v38 }
 0x195   : > { %2622 = vmatprep.subr.bf16.mxu0 %v4995_v24 }
 0x197   : > { %2840 = vmatpush1.bf16.msra.mxu1 %v4996_v33 }
 0x198   : > { %2624 = vmatpush1.bf16.msra.mxu0 %v4997_v32 }
 0x19a   : > { %2203 = vmatmul.mubr.f32.vlgmr.msra.gmra.mrb[0].mxu1 %v4991_v7 }
 0x19b   : > { %1387 = vmatmul.mubr.f32.vlgmr.msra.gmra.mrb[0].mxu0 %v4991_v7  ;;  %2208 = vmatprep.mubr.f32.mxu1 %v4992_v19 }
 0x19c   : > { %1393 = vmatprep.mubr.f32.mxu0 %v4992_v19 }
 0x19e   : > { %2210 = vmatmul.mubr.f32.gmra.mrb[2].mxu1 %v4993_v2 }
 0x19f   : > { %1395 = vmatmul.mubr.f32.gmra.mrb[2].mxu0 %v4993_v2 }
 0x26d   : > { %v2204_v38 = vpop.f32.mrb[0].mxu1 }
 0x26e   : > { %2217 = vst.msk [vmem:[%s177_s17 + $0x10] sm:$0xff] %vm256_vm0, %v2204_v38  ;;  %v1388_v23 = vpop.f32.mrb[0].mxu0  ;;  %v2206_v9 = vpop.f32.mrb[1].mxu1 }
 0x26f   : > { %2215 = vst [vmem:[%s177_s17] sm:$0xff] %v1388_v23  ;;  %v1390_v55 = vpop.f32.mrb[1].mxu0 }
 0x270   : > { %2216 = vst [vmem:[%s177_s17 + $0x8] sm:$0xff] %v1390_v55 }
 0x271   : > { %v2211_v31 = vpop.f32.mrb[2].mxu1 }
 0x272   : > { %2220 = vst.msk [vmem:[%s177_s17 + $0x28] sm:$0xff] %vm256_vm0, %v2211_v31  ;;  %v1396_v3 = vpop.f32.mrb[2].mxu0  ;;  %v2213_v5 = vpop.f32.mrb[3].mxu1 }
 0x273   : > { %2218 = vst [vmem:[%s177_s17 + $0x18] sm:$0xff] %v1396_v3  ;;  %v1398_v8 = vpop.f32.mrb[3].mxu0 }
 0x274   : > { %2219 = vst [vmem:[%s177_s17 + $0x20] sm:$0xff] %v1398_v8 }
 0x275   : > { %3018 = shalt.err (!%p3015_p7)
}
 0x276   : > { %s3019_s24 = scalar_lea.hbm %s4342_s4, 768  ;;  %s3023_s26 = scalar_lea.hbm %s4389_s2, 1536 }
 0x277   : > { %p3020_p9 = scmp.ne.s32.totalorder %s4342_s4, %s3019_s24  ;;  %p3024_p5 = scmp.lt.u32.totalorder %s4342_s4, %s4389_s2 }
 0x278   : > { %p3025_p11 = scmp.lt.u32.totalorder %s3023_s26, %s3019_s24  ;;  %p3027_p4 = scmp.lt.u32.totalorder %s3019_s24, %s4342_s4 }
 0x279   : > { %p3021_p2 = pnand %p3020_p9, %p3193_p12 }
 0x27a   : > { %p3026_p1 = por %p3025_p11, %p3024_p5 }
 0x27b   : > { %p3022_p0 = pneg %p3021_p2 }
 0x27c   : > { %p3028_p6 = por %p3027_p4, %p3026_p1 }
 0x27e   : > { %p3029_p8 = pnand %p3028_p6, %p3022_p0 }
 0x280   : > { %3032 = shalt.err (!%p3029_p8)
}
 0x281   : > { %s3085_s3 = smov 384   ;;  %s3086_s15 = smov 24  }
 0x282   : > { %2889 = dma.vmem_to_hbm [thread:$0]  (%p3193_p12), %s4337_s27, 768, %s4342_s4, %s2222_s13, %s3085_s3, %s3085_s3, %s3086_s15  }
 0x283 PF: > { %s2251_s17 = sand.u32 1, %s3063_s9   ;;  %p4998_p10 = scmp.ne.s32.totalorder %s4646_s16, 0 }
 0x284   : > { %p4999_p13 = scmp.ge.s32.totalorder %s3075_s12, 2  ;;  %s2252_s22 = scalar_lea.sflag [#allocation4], %s2251_s17 }
 0x286   : > { %p2900_p3 = pnand %p4999_p13, %p4998_p10 }
 0x288   : > { %3058 = dma.done.wait (!%p2900_p3), %s2252_s22, 768  }
 0x289   : > { %3060 = vsyncadd (!%p2900_p3), %s2252_s22, 4294966528  ;;  %p16_p7 = scmp.ge.s32.totalorder %s3158_s21, 4   ;;  %s5000_s9 = smov %s3067_s10 }
 0x28a   : > { %s5001_s10 = smov %s3071_s11  ;;  %s5002_s11 = smov %s3189_s8 }
 0x28b   : > { %s5003_s12 = smov %s3158_s21  ;;  %18 = sbr.rel (!%p16_p7) target bundleno = 6 (0x6), region = 77 }
 0x292   :  { %2257 = vsyncpa [#allocation3], 1 }
 0x293   :  { %2259 = vsyncpa [#allocation3 + $0x1], 1 }
 0x294   :  { %2260 = vsyncpa [#allocation6], 1 }
 0x295   :  { %2261 = vsyncpa [#allocation4], 1 }
 0x296   :  { %2263 = vsyncpa [#allocation4 + $0x1], 1 }

</bundles_post_ra>
